<compile_context>
chip_gen: v6e
topology: v6e:2x2x1
jax: 0.10.0
libtpu: 0.0.40
codegen_flags: <defaults>
</compile_context>

<pallas_src>
import numpy as np
import jax
import jax.numpy as jnp
from jax.experimental import pallas as pl
from jax.experimental.pallas import tpu as pltpu


def init_params(key, n_feat, num_cab):
    """Random parameters stored in the kernel's im2col layout.

    wa/wb/w_last: (Cout, 9*Cin) with column index (ky*3+kx)*Cin + ci.
    wsa: (num_cab, 20) -> per block [SA conv1 taps 0..8, bias, SA conv2 taps 0..8, bias].
    """
    C = n_feat
    ks = jax.random.split(key, 6)
    nrm = lambda k, shape, s=0.1: s * jax.random.normal(k, shape, jnp.float32)
    return dict(
        wa=nrm(ks[0], (num_cab, C, 9 * C)),
        ba=nrm(ks[1], (num_cab, C, 1)),
        wb=nrm(ks[2], (num_cab, C, 9 * C)),
        bb=nrm(ks[3], (num_cab, C, 1)),
        wsa=nrm(ks[4], (num_cab, 20)),
        w_last=nrm(ks[5], (C, 9 * C)),              # final ORB conv, bias=False
        alpha=jnp.full((1, 1), 0.25, jnp.float32),  # nn.PReLU() default, shared
    )


def _tap_masks(H, W):
    """(9, H*W) 0/1 f32 masks; tap k=(dy+1)*3+(dx+1) valid where (y+dy,x+dx) in-bounds."""
    yy, xx = np.meshgrid(np.arange(H), np.arange(W), indexing="ij")
    rows = []
    for dy in (-1, 0, 1):
        for dx in (-1, 0, 1):
            ok = (yy + dy >= 0) & (yy + dy < H) & (xx + dx >= 0) & (xx + dx < W)
            rows.append(ok.reshape(-1).astype(np.float32))
    return jnp.asarray(np.stack(rows, axis=0))


def orb_sab_forward(x_nchw, params):
    """ORB_sab forward. x_nchw: (N, C, H, W) float32 -> (N, C, H, W)."""
    N, C, H, W = x_nchw.shape
    HW = H * W
    num_cab = params["wa"].shape[0]
    CENTER = 4  # tap (dy=0, dx=0)

    # NCHW -> (N, C, H*W): pure reshape, no transpose. Spatial goes on lanes.
    x = x_nchw.reshape(N, C, HW).astype(jnp.float32)
    masks = _tap_masks(H, W)                                    # (9, HW)

    def kernel(x_ref, mask_ref, wa_ref, ba_ref, wb_ref, bb_ref, wlast_ref,
               wsa_ref, alpha_ref, out_ref, h_ref):
        cab = pl.program_id(1)
        alpha = alpha_ref[0, 0]                                 # SMEM scalar

        @pl.when(cab == 0)
        def _():
            h_ref[...] = x_ref[0]                               # init running h

        # Hoisted boundary masks: one (1,HW) and one pre-broadcast (C,HW) 0/1
        # mask per non-center tap, built once per grid step and reused by every
        # conv in the step (JAX does not CSE cmps/broadcasts, so hoist here).
        mrows = mask_ref[...]                                   # (9, HW)
        smask = [mrows[k:k + 1] if k != CENTER else None for k in range(9)]
        bmask = [jnp.broadcast_to(m, (C, HW)) if m is not None else None
                 for m in smask]

        def taps(v, tap_masks):
            """Nine zero-padded 3x3 shift taps of v (rows, HW): roll + 1 vmul."""
            outs = []
            k = 0
            for dy in (-1, 0, 1):
                for dx in (-1, 0, 1):
                    d = dy * W + dx
                    # t[p] = v[p + d] at valid positions; roll is circular,
                    # wrapped/out-of-image positions are zeroed by the mask.
                    t = v if d == 0 else pltpu.roll(v, shift=(-d) % HW, axis=1)
                    if tap_masks[k] is not None:
                        t = t * tap_masks[k]
                    outs.append(t)
                    k += 1
            return outs

        def conv3x3(v, w_f32, b):
            # Fused-K im2col: one MXU matmul (Cout,9Cin)@(9Cin,HW),
            # bf16 operands, f32 accumulate.
            patch = jnp.concatenate(taps(v, bmask), axis=0).astype(jnp.bfloat16)
            out = jnp.dot(w_f32.astype(jnp.bfloat16), patch,
                          preferred_element_type=jnp.float32)
            return out if b is None else out + b                # (Cout,1) bcast

        def conv3x3_1ch(v, off):
            # 1->1 3x3 conv on (1, HW): 9 scalar*vector FMAs, weights in SMEM.
            ts = taps(v, smask)
            acc = ts[0] * wsa_ref[cab, off + 0]
            for t in range(1, 9):
                acc = acc + ts[t] * wsa_ref[cab, off + t]
            return acc + wsa_ref[cab, off + 9]

        # ---- one SAB block per grid step ----
        r = conv3x3(h_ref[...], wa_ref[0], ba_ref[0])
        r = jnp.where(r >= 0, r, alpha * r)                     # shared PReLU
        r = conv3x3(r, wb_ref[0], bb_ref[0])
        # SALayer: channel mean on the (idle) MXU instead of an XLU reduce.
        y = jnp.dot(jnp.full((1, C), 1.0 / C, jnp.float32), r,
                    preferred_element_type=jnp.float32)         # (1, HW)
        y = jnp.maximum(conv3x3_1ch(y, 0), 0.0)
        y = jax.nn.sigmoid(conv3x3_1ch(y, 10))
        h_ref[...] = h_ref[...] + r * y                         # SAB residual

        @pl.when(cab == num_cab - 1)
        def _():
            out = conv3x3(h_ref[...], wlast_ref[...], None)
            out_ref[0] = out + x_ref[0]                         # ORB residual

    smem = pl.BlockSpec(memory_space=pltpu.MemorySpace.SMEM)
    grid_spec = pltpu.PrefetchScalarGridSpec(
        num_scalar_prefetch=0,
        grid=(N, num_cab),
        in_specs=[
            pl.BlockSpec((1, C, HW), lambda b, i: (b, 0, 0)),       # x (resident over cab)
            pl.BlockSpec((9, HW), lambda b, i: (0, 0)),             # tap masks (resident)
            pl.BlockSpec((1, C, 9 * C), lambda b, i: (i, 0, 0)),    # wa[cab]
            pl.BlockSpec((1, C, 1), lambda b, i: (i, 0, 0)),        # ba[cab]
            pl.BlockSpec((1, C, 9 * C), lambda b, i: (i, 0, 0)),    # wb[cab]
            pl.BlockSpec((1, C, 1), lambda b, i: (i, 0, 0)),        # bb[cab]
            pl.BlockSpec((C, 9 * C), lambda b, i: (0, 0)),          # w_last (resident)
            smem,                                                   # wsa (scalars)
            smem,                                                   # alpha
        ],
        out_specs=pl.BlockSpec((1, C, HW), lambda b, i: (b, 0, 0)),
        scratch_shapes=[pltpu.VMEM((C, HW), jnp.float32)],          # running h
    )

    # TODO(synk): for production-size feature maps (e.g. C~80, 256x256) add H
    # row-tiling with a +/-1-row halo (h carried in HBM between CAB steps) so
    # blocks fit v7x's 64 MiB VMEM; toy shapes fit in one block per batch.
    # For N == 1 on v7x, that row-tile axis should also be marked "parallel".
    out = pl.pallas_call(
        kernel,
        out_shape=jax.ShapeDtypeStruct((N, C, HW), jnp.float32),
        grid_spec=grid_spec,
        compiler_params=pltpu.CompilerParams(
            dimension_semantics=("parallel", "arbitrary"),
            vmem_limit_bytes=32 * 1024 * 1024),
    )(x, masks, params["wa"], params["ba"], params["wb"], params["bb"],
      params["w_last"], params["wsa"], params["alpha"])

    return out.reshape(N, C, H, W)


def reference_forward(x, p):
    """Pure-JAX NCHW reference matching the PyTorch ORB_sab forward."""
    prec = jax.lax.Precision.HIGHEST
    num_cab = p["wa"].shape[0]

    def conv3(v, w_mat, b):
        cout = w_mat.shape[0]
        cin = w_mat.shape[1] // 9
        w = w_mat.reshape(cout, 3, 3, cin).transpose(0, 3, 1, 2)    # OIHW
        out = jax.lax.conv_general_dilated(
            v, w, window_strides=(1, 1), padding=((1, 1), (1, 1)),
            dimension_numbers=("NCHW", "OIHW", "NCHW"), precision=prec)
        if b is not None:
            out = out + b.reshape(1, -1, 1, 1)
        return out

    alpha = p["alpha"][0, 0]
    prelu = lambda v: jnp.where(v >= 0, v, alpha * v)

    h = x
    for i in range(num_cab):
        r = conv3(h, p["wa"][i], p["ba"][i][:, 0])
        r = prelu(r)
        r = conv3(r, p["wb"][i], p["bb"][i][:, 0])
        y = jnp.mean(r, axis=1, keepdims=True)
        w1 = p["wsa"][i, :10]
        w2 = p["wsa"][i, 10:]
        y = jnp.maximum(conv3(y, w1[:9].reshape(1, 9), w1[9:10]), 0.0)
        y = jax.nn.sigmoid(conv3(y, w2[:9].reshape(1, 9), w2[9:10]))
        r = r * y
        h = h + r
    out = conv3(h, p["w_last"], None)
    return out + x


if __name__ == "__main__":
    key = jax.random.PRNGKey(0)
    # ORB_sab(n_feat=8, kernel_size=3, reduction=4, act=PReLU, bias=True, num_cab=2)
    N, C, H, W = 2, 8, 16, 16
    num_cab = 2

    k_x, k_p = jax.random.split(key)
    x = jax.random.normal(k_x, (N, C, H, W), jnp.float32)
    params = init_params(k_p, n_feat=C, num_cab=num_cab)

    out = orb_sab_forward(x, params)
    jax.block_until_ready(out)

    out_ref = reference_forward(x, params)
    # bf16 MXU operands (f32 accumulate) vs. f32 HIGHEST-precision reference.
    np.testing.assert_allclose(np.asarray(out), np.asarray(out_ref),
                               rtol=3e-2, atol=3e-2)

    print("KERNEL_OK")
</pallas_src>

<mosaic_0001>
module attributes {stable_mosaic.version = 11 : i64} {
  func.func @kernel(%arg0: i32, %arg1: i32, %arg2: memref<1x8x256xf32, #tpu.memory_space<vmem>>, %arg3: memref<9x256xf32, #tpu.memory_space<vmem>>, %arg4: memref<1x8x72xf32, #tpu.memory_space<vmem>>, %arg5: memref<1x8x1xf32, #tpu.memory_space<vmem>>, %arg6: memref<1x8x72xf32, #tpu.memory_space<vmem>>, %arg7: memref<1x8x1xf32, #tpu.memory_space<vmem>>, %arg8: memref<8x72xf32, #tpu.memory_space<vmem>>, %arg9: memref<2x20xf32, #tpu.memory_space<smem>>, %arg10: memref<1x1xf32, #tpu.memory_space<smem>>, %arg11: memref<1x8x256xf32, #tpu.memory_space<vmem>>, %arg12: memref<8x256xf32, #tpu.memory_space<vmem>>) attributes {dimension_semantics = [#tpu.dimension_semantics<parallel>, #tpu.dimension_semantics<arbitrary>], iteration_bounds = array<i64: 2, 2>, scalar_prefetch = 0 : i64, scratch_operands = 1 : i64, tpu.core_type = #tpu.core_type<tc>, window_params = [{transform_indices = @transform_0, window_bounds = array<i64: 1, 8, 256>}, {pipeline_mode = #tpu.pipeline_mode<synchronous>, transform_indices = @transform_1, window_bounds = array<i64: 9, 256>}, {transform_indices = @transform_2, window_bounds = array<i64: 1, 8, 72>}, {transform_indices = @transform_3, window_bounds = array<i64: 1, 8, 1>}, {transform_indices = @transform_4, window_bounds = array<i64: 1, 8, 72>}, {transform_indices = @transform_5, window_bounds = array<i64: 1, 8, 1>}, {pipeline_mode = #tpu.pipeline_mode<synchronous>, transform_indices = @transform_6, window_bounds = array<i64: 8, 72>}, {transform_indices = @transform_7, window_bounds = array<i64: 2, 20>}, {transform_indices = @transform_8, window_bounds = array<i64: 1, 1>}, {transform_indices = @transform_9, window_bounds = array<i64: 1, 8, 256>}]} {
    %c0 = arith.constant 0 : index
    %c0_0 = arith.constant 0 : index
    %0 = memref.load %arg10[%c0, %c0_0] : memref<1x1xf32, #tpu.memory_space<smem>>
    %c0_i32 = arith.constant 0 : i32
    %1 = arith.cmpi eq, %arg1, %c0_i32 : i32
    %2 = arith.extui %1 : i1 to i32
    %c0_i32_1 = arith.constant 0 : i32
    %3 = arith.cmpi ne, %2, %c0_i32_1 : i32
    scf.if %3 {
      %c0_55 = arith.constant 0 : index
      %c0_56 = arith.constant 0 : index
      %c0_57 = arith.constant 0 : index
      %232 = vector.load %arg2[%c0_55, %c0_56, %c0_57] : memref<1x8x256xf32, #tpu.memory_space<vmem>>, vector<1x8x256xf32>
      %233 = vector.shape_cast %232 : vector<1x8x256xf32> to vector<8x256xf32>
      %c0_58 = arith.constant 0 : index
      %c0_59 = arith.constant 0 : index
      %234 = vector.load %arg12[%c0_58, %c0_59] : memref<8x256xf32, #tpu.memory_space<vmem>>, vector<8x256xf32>
      tpu.vector_store %arg12[%c0_58, %c0_59], %233 {strides = array<i32>} : memref<8x256xf32, #tpu.memory_space<vmem>>, vector<8x256xf32>,
    } else {
    }
    %c0_2 = arith.constant 0 : index
    %c0_3 = arith.constant 0 : index
    %4 = vector.load %arg3[%c0_2, %c0_3] : memref<9x256xf32, #tpu.memory_space<vmem>>, vector<9x256xf32>
    %5 = vector.extract_strided_slice %4 {offsets = [0, 0], sizes = [1, 256], strides = [1, 1]} : vector<9x256xf32> to vector<1x256xf32>
    %6 = vector.extract_strided_slice %4 {offsets = [1, 0], sizes = [1, 256], strides = [1, 1]} : vector<9x256xf32> to vector<1x256xf32>
    %7 = vector.extract_strided_slice %4 {offsets = [2, 0], sizes = [1, 256], strides = [1, 1]} : vector<9x256xf32> to vector<1x256xf32>
    %8 = vector.extract_strided_slice %4 {offsets = [3, 0], sizes = [1, 256], strides = [1, 1]} : vector<9x256xf32> to vector<1x256xf32>
    %9 = vector.extract_strided_slice %4 {offsets = [5, 0], sizes = [1, 256], strides = [1, 1]} : vector<9x256xf32> to vector<1x256xf32>
    %10 = vector.extract_strided_slice %4 {offsets = [6, 0], sizes = [1, 256], strides = [1, 1]} : vector<9x256xf32> to vector<1x256xf32>
    %11 = vector.extract_strided_slice %4 {offsets = [7, 0], sizes = [1, 256], strides = [1, 1]} : vector<9x256xf32> to vector<1x256xf32>
    %12 = vector.extract_strided_slice %4 {offsets = [8, 0], sizes = [1, 256], strides = [1, 1]} : vector<9x256xf32> to vector<1x256xf32>
    %13 = vector.shape_cast %5 : vector<1x256xf32> to vector<1x256xf32>
    %14 = vector.broadcast %13 : vector<1x256xf32> to vector<8x256xf32>
    %15 = vector.shape_cast %6 : vector<1x256xf32> to vector<1x256xf32>
    %16 = vector.broadcast %15 : vector<1x256xf32> to vector<8x256xf32>
    %17 = vector.shape_cast %7 : vector<1x256xf32> to vector<1x256xf32>
    %18 = vector.broadcast %17 : vector<1x256xf32> to vector<8x256xf32>
    %19 = vector.shape_cast %8 : vector<1x256xf32> to vector<1x256xf32>
    %20 = vector.broadcast %19 : vector<1x256xf32> to vector<8x256xf32>
    %21 = vector.shape_cast %9 : vector<1x256xf32> to vector<1x256xf32>
    %22 = vector.broadcast %21 : vector<1x256xf32> to vector<8x256xf32>
    %23 = vector.shape_cast %10 : vector<1x256xf32> to vector<1x256xf32>
    %24 = vector.broadcast %23 : vector<1x256xf32> to vector<8x256xf32>
    %25 = vector.shape_cast %11 : vector<1x256xf32> to vector<1x256xf32>
    %26 = vector.broadcast %25 : vector<1x256xf32> to vector<8x256xf32>
    %27 = vector.shape_cast %12 : vector<1x256xf32> to vector<1x256xf32>
    %28 = vector.broadcast %27 : vector<1x256xf32> to vector<8x256xf32>
    %c0_4 = arith.constant 0 : index
    %c0_5 = arith.constant 0 : index
    %29 = vector.load %arg12[%c0_4, %c0_5] : memref<8x256xf32, #tpu.memory_space<vmem>>, vector<8x256xf32>
    %c0_6 = arith.constant 0 : index
    %c0_7 = arith.constant 0 : index
    %c0_8 = arith.constant 0 : index
    %30 = vector.load %arg4[%c0_6, %c0_7, %c0_8] : memref<1x8x72xf32, #tpu.memory_space<vmem>>, vector<1x8x72xf32>
    %31 = vector.shape_cast %30 : vector<1x8x72xf32> to vector<8x72xf32>
    %c0_9 = arith.constant 0 : index
    %c0_10 = arith.constant 0 : index
    %c0_11 = arith.constant 0 : index
    %32 = vector.load %arg5[%c0_9, %c0_10, %c0_11] : memref<1x8x1xf32, #tpu.memory_space<vmem>>, vector<1x8x1xf32>
    %33 = vector.shape_cast %32 : vector<1x8x1xf32> to vector<8x1xf32>
    %c17_i32 = arith.constant 17 : i32
    %34 = tpu.dynamic_rotate %29 by %c17_i32 dim 1 : vector<8x256xf32>, i32 -> vector<8x256xf32>
    %35 = arith.mulf %34, %14 : vector<8x256xf32>
    %c16_i32 = arith.constant 16 : i32
    %36 = tpu.dynamic_rotate %29 by %c16_i32 dim 1 : vector<8x256xf32>, i32 -> vector<8x256xf32>
    %37 = arith.mulf %36, %16 : vector<8x256xf32>
    %c15_i32 = arith.constant 15 : i32
    %38 = tpu.dynamic_rotate %29 by %c15_i32 dim 1 : vector<8x256xf32>, i32 -> vector<8x256xf32>
    %39 = arith.mulf %38, %18 : vector<8x256xf32>
    %c1_i32 = arith.constant 1 : i32
    %40 = tpu.dynamic_rotate %29 by %c1_i32 dim 1 : vector<8x256xf32>, i32 -> vector<8x256xf32>
    %41 = arith.mulf %40, %20 : vector<8x256xf32>
    %c255_i32 = arith.constant 255 : i32
    %42 = tpu.dynamic_rotate %29 by %c255_i32 dim 1 : vector<8x256xf32>, i32 -> vector<8x256xf32>
    %43 = arith.mulf %42, %22 : vector<8x256xf32>
    %c241_i32 = arith.constant 241 : i32
    %44 = tpu.dynamic_rotate %29 by %c241_i32 dim 1 : vector<8x256xf32>, i32 -> vector<8x256xf32>
    %45 = arith.mulf %44, %24 : vector<8x256xf32>
    %c240_i32 = arith.constant 240 : i32
    %46 = tpu.dynamic_rotate %29 by %c240_i32 dim 1 : vector<8x256xf32>, i32 -> vector<8x256xf32>
    %47 = arith.mulf %46, %26 : vector<8x256xf32>
    %c239_i32 = arith.constant 239 : i32
    %48 = tpu.dynamic_rotate %29 by %c239_i32 dim 1 : vector<8x256xf32>, i32 -> vector<8x256xf32>
    %49 = arith.mulf %48, %28 : vector<8x256xf32>
    %50 = tpu.concatenate %35, %37, %39, %41, %29, %43, %45, %47, %49 in 0 : vector<8x256xf32>, vector<8x256xf32>, vector<8x256xf32>, vector<8x256xf32>, vector<8x256xf32>, vector<8x256xf32>, vector<8x256xf32>, vector<8x256xf32>, vector<8x256xf32> -> vector<72x256xf32>
    %51 = arith.truncf %50 : vector<72x256xf32> to vector<72x256xbf16>
    %52 = arith.truncf %31 : vector<8x72xf32> to vector<8x72xbf16>
    %cst = arith.constant dense<0.000000e+00> : vector<8x256xf32>
    %53 = tpu.matmul %52, %51, %cst {dimension_numbers = #tpu.dot_dimension_numbers<[1], [0], [0], [1], [0, 0, 1, 1], [], []>} : vector<8x72xbf16>, vector<72x256xbf16>, vector<8x256xf32> -> vector<8x256xf32>
    %54 = vector.broadcast %33 : vector<8x1xf32> to vector<8x256xf32>
    %55 = arith.addf %53, %54 : vector<8x256xf32>
    %cst_12 = arith.constant 0.000000e+00 : f32
    %56 = vector.broadcast %cst_12 : f32 to vector<8x256xf32>
    %57 = arith.cmpf oge, %55, %56 : vector<8x256xf32>
    %58 = vector.broadcast %0 : f32 to vector<8x256xf32>
    %59 = arith.mulf %58, %55 : vector<8x256xf32>
    %60 = arith.select %57, %55, %59 : vector<8x256xi1>, vector<8x256xf32>
    %c0_13 = arith.constant 0 : index
    %c0_14 = arith.constant 0 : index
    %c0_15 = arith.constant 0 : index
    %61 = vector.load %arg6[%c0_13, %c0_14, %c0_15] : memref<1x8x72xf32, #tpu.memory_space<vmem>>, vector<1x8x72xf32>
    %62 = vector.shape_cast %61 : vector<1x8x72xf32> to vector<8x72xf32>
    %c0_16 = arith.constant 0 : index
    %c0_17 = arith.constant 0 : index
    %c0_18 = arith.constant 0 : index
    %63 = vector.load %arg7[%c0_16, %c0_17, %c0_18] : memref<1x8x1xf32, #tpu.memory_space<vmem>>, vector<1x8x1xf32>
    %64 = vector.shape_cast %63 : vector<1x8x1xf32> to vector<8x1xf32>
    %c17_i32_19 = arith.constant 17 : i32
    %65 = tpu.dynamic_rotate %60 by %c17_i32_19 dim 1 : vector<8x256xf32>, i32 -> vector<8x256xf32>
    %66 = arith.mulf %65, %14 : vector<8x256xf32>
    %c16_i32_20 = arith.constant 16 : i32
    %67 = tpu.dynamic_rotate %60 by %c16_i32_20 dim 1 : vector<8x256xf32>, i32 -> vector<8x256xf32>
    %68 = arith.mulf %67, %16 : vector<8x256xf32>
    %c15_i32_21 = arith.constant 15 : i32
    %69 = tpu.dynamic_rotate %60 by %c15_i32_21 dim 1 : vector<8x256xf32>, i32 -> vector<8x256xf32>
    %70 = arith.mulf %69, %18 : vector<8x256xf32>
    %c1_i32_22 = arith.constant 1 : i32
    %71 = tpu.dynamic_rotate %60 by %c1_i32_22 dim 1 : vector<8x256xf32>, i32 -> vector<8x256xf32>
    %72 = arith.mulf %71, %20 : vector<8x256xf32>
    %c255_i32_23 = arith.constant 255 : i32
    %73 = tpu.dynamic_rotate %60 by %c255_i32_23 dim 1 : vector<8x256xf32>, i32 -> vector<8x256xf32>
    %74 = arith.mulf %73, %22 : vector<8x256xf32>
    %c241_i32_24 = arith.constant 241 : i32
    %75 = tpu.dynamic_rotate %60 by %c241_i32_24 dim 1 : vector<8x256xf32>, i32 -> vector<8x256xf32>
    %76 = arith.mulf %75, %24 : vector<8x256xf32>
    %c240_i32_25 = arith.constant 240 : i32
    %77 = tpu.dynamic_rotate %60 by %c240_i32_25 dim 1 : vector<8x256xf32>, i32 -> vector<8x256xf32>
    %78 = arith.mulf %77, %26 : vector<8x256xf32>
    %c239_i32_26 = arith.constant 239 : i32
    %79 = tpu.dynamic_rotate %60 by %c239_i32_26 dim 1 : vector<8x256xf32>, i32 -> vector<8x256xf32>
    %80 = arith.mulf %79, %28 : vector<8x256xf32>
    %81 = tpu.concatenate %66, %68, %70, %72, %60, %74, %76, %78, %80 in 0 : vector<8x256xf32>, vector<8x256xf32>, vector<8x256xf32>, vector<8x256xf32>, vector<8x256xf32>, vector<8x256xf32>, vector<8x256xf32>, vector<8x256xf32>, vector<8x256xf32> -> vector<72x256xf32>
    %82 = arith.truncf %81 : vector<72x256xf32> to vector<72x256xbf16>
    %83 = arith.truncf %62 : vector<8x72xf32> to vector<8x72xbf16>
    %cst_27 = arith.constant dense<0.000000e+00> : vector<8x256xf32>
    %84 = tpu.matmul %83, %82, %cst_27 {dimension_numbers = #tpu.dot_dimension_numbers<[1], [0], [0], [1], [0, 0, 1, 1], [], []>} : vector<8x72xbf16>, vector<72x256xbf16>, vector<8x256xf32> -> vector<8x256xf32>
    %85 = vector.broadcast %64 : vector<8x1xf32> to vector<8x256xf32>
    %86 = arith.addf %84, %85 : vector<8x256xf32>
    %cst_28 = arith.constant 1.250000e-01 : f32
    %87 = vector.broadcast %cst_28 : f32 to vector<1x8xf32>
    %cst_29 = arith.constant dense<0.000000e+00> : vector<1x256xf32>
    %88 = tpu.matmul %87, %86, %cst_29 {dimension_numbers = #tpu.dot_dimension_numbers<[1], [0], [0], [1], [0, 0, 1, 1], [], []>} : vector<1x8xf32>, vector<8x256xf32>, vector<1x256xf32> -> vector<1x256xf32>
    %c17_i32_30 = arith.constant 17 : i32
    %89 = tpu.dynamic_rotate %88 by %c17_i32_30 dim 1 : vector<1x256xf32>, i32 -> vector<1x256xf32>
    %90 = arith.mulf %89, %5 : vector<1x256xf32>
    %c16_i32_31 = arith.constant 16 : i32
    %91 = tpu.dynamic_rotate %88 by %c16_i32_31 dim 1 : vector<1x256xf32>, i32 -> vector<1x256xf32>
    %92 = arith.mulf %91, %6 : vector<1x256xf32>
    %c15_i32_32 = arith.constant 15 : i32
    %93 = tpu.dynamic_rotate %88 by %c15_i32_32 dim 1 : vector<1x256xf32>, i32 -> vector<1x256xf32>
    %94 = arith.mulf %93, %7 : vector<1x256xf32>
    %c1_i32_33 = arith.constant 1 : i32
    %95 = tpu.dynamic_rotate %88 by %c1_i32_33 dim 1 : vector<1x256xf32>, i32 -> vector<1x256xf32>
    %96 = arith.mulf %95, %8 : vector<1x256xf32>
    %c255_i32_34 = arith.constant 255 : i32
    %97 = tpu.dynamic_rotate %88 by %c255_i32_34 dim 1 : vector<1x256xf32>, i32 -> vector<1x256xf32>
    %98 = arith.mulf %97, %9 : vector<1x256xf32>
    %c241_i32_35 = arith.constant 241 : i32
    %99 = tpu.dynamic_rotate %88 by %c241_i32_35 dim 1 : vector<1x256xf32>, i32 -> vector<1x256xf32>
    %100 = arith.mulf %99, %10 : vector<1x256xf32>
    %c240_i32_36 = arith.constant 240 : i32
    %101 = tpu.dynamic_rotate %88 by %c240_i32_36 dim 1 : vector<1x256xf32>, i32 -> vector<1x256xf32>
    %102 = arith.mulf %101, %11 : vector<1x256xf32>
    %c239_i32_37 = arith.constant 239 : i32
    %103 = tpu.dynamic_rotate %88 by %c239_i32_37 dim 1 : vector<1x256xf32>, i32 -> vector<1x256xf32>
    %104 = arith.mulf %103, %12 : vector<1x256xf32>
    %105 = arith.index_cast %arg1 : i32 to index
    %c0_38 = arith.constant 0 : index
    %106 = memref.load %arg9[%105, %c0_38] : memref<2x20xf32, #tpu.memory_space<smem>>
    %107 = vector.broadcast %106 : f32 to vector<1x256xf32>
    %108 = arith.mulf %90, %107 : vector<1x256xf32>
    %109 = arith.index_cast %arg1 : i32 to index
    %c1 = arith.constant 1 : index
    %110 = memref.load %arg9[%109, %c1] : memref<2x20xf32, #tpu.memory_space<smem>>
    %111 = vector.broadcast %110 : f32 to vector<1x256xf32>
    %112 = arith.mulf %92, %111 : vector<1x256xf32>
    %113 = arith.addf %108, %112 : vector<1x256xf32>
    %114 = arith.index_cast %arg1 : i32 to index
    %c2 = arith.constant 2 : index
    %115 = memref.load %arg9[%114, %c2] : memref<2x20xf32, #tpu.memory_space<smem>>
    %116 = vector.broadcast %115 : f32 to vector<1x256xf32>
    %117 = arith.mulf %94, %116 : vector<1x256xf32>
    %118 = arith.addf %113, %117 : vector<1x256xf32>
    %119 = arith.index_cast %arg1 : i32 to index
    %c3 = arith.constant 3 : index
    %120 = memref.load %arg9[%119, %c3] : memref<2x20xf32, #tpu.memory_space<smem>>
    %121 = vector.broadcast %120 : f32 to vector<1x256xf32>
    %122 = arith.mulf %96, %121 : vector<1x256xf32>
    %123 = arith.addf %118, %122 : vector<1x256xf32>
    %124 = arith.index_cast %arg1 : i32 to index
    %c4 = arith.constant 4 : index
    %125 = memref.load %arg9[%124, %c4] : memref<2x20xf32, #tpu.memory_space<smem>>
    %126 = vector.broadcast %125 : f32 to vector<1x256xf32>
    %127 = arith.mulf %88, %126 : vector<1x256xf32>
    %128 = arith.addf %123, %127 : vector<1x256xf32>
    %129 = arith.index_cast %arg1 : i32 to index
    %c5 = arith.constant 5 : index
    %130 = memref.load %arg9[%129, %c5] : memref<2x20xf32, #tpu.memory_space<smem>>
    %131 = vector.broadcast %130 : f32 to vector<1x256xf32>
    %132 = arith.mulf %98, %131 : vector<1x256xf32>
    %133 = arith.addf %128, %132 : vector<1x256xf32>
    %134 = arith.index_cast %arg1 : i32 to index
    %c6 = arith.constant 6 : index
    %135 = memref.load %arg9[%134, %c6] : memref<2x20xf32, #tpu.memory_space<smem>>
    %136 = vector.broadcast %135 : f32 to vector<1x256xf32>
    %137 = arith.mulf %100, %136 : vector<1x256xf32>
    %138 = arith.addf %133, %137 : vector<1x256xf32>
    %139 = arith.index_cast %arg1 : i32 to index
    %c7 = arith.constant 7 : index
    %140 = memref.load %arg9[%139, %c7] : memref<2x20xf32, #tpu.memory_space<smem>>
    %141 = vector.broadcast %140 : f32 to vector<1x256xf32>
    %142 = arith.mulf %102, %141 : vector<1x256xf32>
    %143 = arith.addf %138, %142 : vector<1x256xf32>
    %144 = arith.index_cast %arg1 : i32 to index
    %c8 = arith.constant 8 : index
    %145 = memref.load %arg9[%144, %c8] : memref<2x20xf32, #tpu.memory_space<smem>>
    %146 = vector.broadcast %145 : f32 to vector<1x256xf32>
    %147 = arith.mulf %104, %146 : vector<1x256xf32>
    %148 = arith.addf %143, %147 : vector<1x256xf32>
    %149 = arith.index_cast %arg1 : i32 to index
    %c9 = arith.constant 9 : index
    %150 = memref.load %arg9[%149, %c9] : memref<2x20xf32, #tpu.memory_space<smem>>
    %151 = vector.broadcast %150 : f32 to vector<1x256xf32>
    %152 = arith.addf %148, %151 : vector<1x256xf32>
    %cst_39 = arith.constant 0.000000e+00 : f32
    %153 = vector.broadcast %cst_39 : f32 to vector<1x256xf32>
    %154 = arith.maximumf %152, %153 : vector<1x256xf32>
    %c17_i32_40 = arith.constant 17 : i32
    %155 = tpu.dynamic_rotate %154 by %c17_i32_40 dim 1 : vector<1x256xf32>, i32 -> vector<1x256xf32>
    %156 = arith.mulf %155, %5 : vector<1x256xf32>
    %c16_i32_41 = arith.constant 16 : i32
    %157 = tpu.dynamic_rotate %154 by %c16_i32_41 dim 1 : vector<1x256xf32>, i32 -> vector<1x256xf32>
    %158 = arith.mulf %157, %6 : vector<1x256xf32>
    %c15_i32_42 = arith.constant 15 : i32
    %159 = tpu.dynamic_rotate %154 by %c15_i32_42 dim 1 : vector<1x256xf32>, i32 -> vector<1x256xf32>
    %160 = arith.mulf %159, %7 : vector<1x256xf32>
    %c1_i32_43 = arith.constant 1 : i32
    %161 = tpu.dynamic_rotate %154 by %c1_i32_43 dim 1 : vector<1x256xf32>, i32 -> vector<1x256xf32>
    %162 = arith.mulf %161, %8 : vector<1x256xf32>
    %c255_i32_44 = arith.constant 255 : i32
    %163 = tpu.dynamic_rotate %154 by %c255_i32_44 dim 1 : vector<1x256xf32>, i32 -> vector<1x256xf32>
    %164 = arith.mulf %163, %9 : vector<1x256xf32>
    %c241_i32_45 = arith.constant 241 : i32
    %165 = tpu.dynamic_rotate %154 by %c241_i32_45 dim 1 : vector<1x256xf32>, i32 -> vector<1x256xf32>
    %166 = arith.mulf %165, %10 : vector<1x256xf32>
    %c240_i32_46 = arith.constant 240 : i32
    %167 = tpu.dynamic_rotate %154 by %c240_i32_46 dim 1 : vector<1x256xf32>, i32 -> vector<1x256xf32>
    %168 = arith.mulf %167, %11 : vector<1x256xf32>
    %c239_i32_47 = arith.constant 239 : i32
    %169 = tpu.dynamic_rotate %154 by %c239_i32_47 dim 1 : vector<1x256xf32>, i32 -> vector<1x256xf32>
    %170 = arith.mulf %169, %12 : vector<1x256xf32>
    %171 = arith.index_cast %arg1 : i32 to index
    %c10 = arith.constant 10 : index
    %172 = memref.load %arg9[%171, %c10] : memref<2x20xf32, #tpu.memory_space<smem>>
    %173 = vector.broadcast %172 : f32 to vector<1x256xf32>
    %174 = arith.mulf %156, %173 : vector<1x256xf32>
    %175 = arith.index_cast %arg1 : i32 to index
    %c11 = arith.constant 11 : index
    %176 = memref.load %arg9[%175, %c11] : memref<2x20xf32, #tpu.memory_space<smem>>
    %177 = vector.broadcast %176 : f32 to vector<1x256xf32>
    %178 = arith.mulf %158, %177 : vector<1x256xf32>
    %179 = arith.addf %174, %178 : vector<1x256xf32>
    %180 = arith.index_cast %arg1 : i32 to index
    %c12 = arith.constant 12 : index
    %181 = memref.load %arg9[%180, %c12] : memref<2x20xf32, #tpu.memory_space<smem>>
    %182 = vector.broadcast %181 : f32 to vector<1x256xf32>
    %183 = arith.mulf %160, %182 : vector<1x256xf32>
    %184 = arith.addf %179, %183 : vector<1x256xf32>
    %185 = arith.index_cast %arg1 : i32 to index
    %c13 = arith.constant 13 : index
    %186 = memref.load %arg9[%185, %c13] : memref<2x20xf32, #tpu.memory_space<smem>>
    %187 = vector.broadcast %186 : f32 to vector<1x256xf32>
    %188 = arith.mulf %162, %187 : vector<1x256xf32>
    %189 = arith.addf %184, %188 : vector<1x256xf32>
    %190 = arith.index_cast %arg1 : i32 to index
    %c14 = arith.constant 14 : index
    %191 = memref.load %arg9[%190, %c14] : memref<2x20xf32, #tpu.memory_space<smem>>
    %192 = vector.broadcast %191 : f32 to vector<1x256xf32>
    %193 = arith.mulf %154, %192 : vector<1x256xf32>
    %194 = arith.addf %189, %193 : vector<1x256xf32>
    %195 = arith.index_cast %arg1 : i32 to index
    %c15 = arith.constant 15 : index
    %196 = memref.load %arg9[%195, %c15] : memref<2x20xf32, #tpu.memory_space<smem>>
    %197 = vector.broadcast %196 : f32 to vector<1x256xf32>
    %198 = arith.mulf %164, %197 : vector<1x256xf32>
    %199 = arith.addf %194, %198 : vector<1x256xf32>
    %200 = arith.index_cast %arg1 : i32 to index
    %c16 = arith.constant 16 : index
    %201 = memref.load %arg9[%200, %c16] : memref<2x20xf32, #tpu.memory_space<smem>>
    %202 = vector.broadcast %201 : f32 to vector<1x256xf32>
    %203 = arith.mulf %166, %202 : vector<1x256xf32>
    %204 = arith.addf %199, %203 : vector<1x256xf32>
    %205 = arith.index_cast %arg1 : i32 to index
    %c17 = arith.constant 17 : index
    %206 = memref.load %arg9[%205, %c17] : memref<2x20xf32, #tpu.memory_space<smem>>
    %207 = vector.broadcast %206 : f32 to vector<1x256xf32>
    %208 = arith.mulf %168, %207 : vector<1x256xf32>
    %209 = arith.addf %204, %208 : vector<1x256xf32>
    %210 = arith.index_cast %arg1 : i32 to index
    %c18 = arith.constant 18 : index
    %211 = memref.load %arg9[%210, %c18] : memref<2x20xf32, #tpu.memory_space<smem>>
    %212 = vector.broadcast %211 : f32 to vector<1x256xf32>
    %213 = arith.mulf %170, %212 : vector<1x256xf32>
    %214 = arith.addf %209, %213 : vector<1x256xf32>
    %215 = arith.index_cast %arg1 : i32 to index
    %c19 = arith.constant 19 : index
    %216 = memref.load %arg9[%215, %c19] : memref<2x20xf32, #tpu.memory_space<smem>>
    %217 = vector.broadcast %216 : f32 to vector<1x256xf32>
    %218 = arith.addf %214, %217 : vector<1x256xf32>
    %219 = arith.negf %218 : vector<1x256xf32>
    %220 = math.exp %219 : vector<1x256xf32>
    %cst_48 = arith.constant 1.000000e+00 : f32
    %221 = vector.broadcast %cst_48 : f32 to vector<1x256xf32>
    %222 = arith.addf %221, %220 : vector<1x256xf32>
    %223 = arith.divf %221, %222 : vector<1x256xf32>
    %c0_49 = arith.constant 0 : index
    %c0_50 = arith.constant 0 : index
    %224 = vector.load %arg12[%c0_49, %c0_50] : memref<8x256xf32, #tpu.memory_space<vmem>>, vector<8x256xf32>
    %225 = vector.broadcast %223 : vector<1x256xf32> to vector<8x256xf32>
    %226 = arith.mulf %86, %225 : vector<8x256xf32>
    %227 = arith.addf %224, %226 : vector<8x256xf32>
    %c0_51 = arith.constant 0 : index
    %c0_52 = arith.constant 0 : index
    %228 = vector.load %arg12[%c0_51, %c0_52] : memref<8x256xf32, #tpu.memory_space<vmem>>, vector<8x256xf32>
    tpu.vector_store %arg12[%c0_51, %c0_52], %227 {strides = array<i32>} : memref<8x256xf32, #tpu.memory_space<vmem>>, vector<8x256xf32>,
    %c1_i32_53 = arith.constant 1 : i32
    %229 = arith.cmpi eq, %arg1, %c1_i32_53 : i32
    %230 = arith.extui %229 : i1 to i32
    %c0_i32_54 = arith.constant 0 : i32
    %231 = arith.cmpi ne, %230, %c0_i32_54 : i32
    scf.if %231 {
      %c0_55 = arith.constant 0 : index
      %c0_56 = arith.constant 0 : index
      %232 = vector.load %arg12[%c0_55, %c0_56] : memref<8x256xf32, #tpu.memory_space<vmem>>, vector<8x256xf32>
      %c0_57 = arith.constant 0 : index
      %c0_58 = arith.constant 0 : index
      %233 = vector.load %arg8[%c0_57, %c0_58] : memref<8x72xf32, #tpu.memory_space<vmem>>, vector<8x72xf32>
      %c17_i32_59 = arith.constant 17 : i32
      %234 = tpu.dynamic_rotate %232 by %c17_i32_59 dim 1 : vector<8x256xf32>, i32 -> vector<8x256xf32>
      %235 = arith.mulf %234, %14 : vector<8x256xf32>
      %c16_i32_60 = arith.constant 16 : i32
      %236 = tpu.dynamic_rotate %232 by %c16_i32_60 dim 1 : vector<8x256xf32>, i32 -> vector<8x256xf32>
      %237 = arith.mulf %236, %16 : vector<8x256xf32>
      %c15_i32_61 = arith.constant 15 : i32
      %238 = tpu.dynamic_rotate %232 by %c15_i32_61 dim 1 : vector<8x256xf32>, i32 -> vector<8x256xf32>
      %239 = arith.mulf %238, %18 : vector<8x256xf32>
      %c1_i32_62 = arith.constant 1 : i32
      %240 = tpu.dynamic_rotate %232 by %c1_i32_62 dim 1 : vector<8x256xf32>, i32 -> vector<8x256xf32>
      %241 = arith.mulf %240, %20 : vector<8x256xf32>
      %c255_i32_63 = arith.constant 255 : i32
      %242 = tpu.dynamic_rotate %232 by %c255_i32_63 dim 1 : vector<8x256xf32>, i32 -> vector<8x256xf32>
      %243 = arith.mulf %242, %22 : vector<8x256xf32>
      %c241_i32_64 = arith.constant 241 : i32
      %244 = tpu.dynamic_rotate %232 by %c241_i32_64 dim 1 : vector<8x256xf32>, i32 -> vector<8x256xf32>
      %245 = arith.mulf %244, %24 : vector<8x256xf32>
      %c240_i32_65 = arith.constant 240 : i32
      %246 = tpu.dynamic_rotate %232 by %c240_i32_65 dim 1 : vector<8x256xf32>, i32 -> vector<8x256xf32>
      %247 = arith.mulf %246, %26 : vector<8x256xf32>
      %c239_i32_66 = arith.constant 239 : i32
      %248 = tpu.dynamic_rotate %232 by %c239_i32_66 dim 1 : vector<8x256xf32>, i32 -> vector<8x256xf32>
      %249 = arith.mulf %248, %28 : vector<8x256xf32>
      %250 = tpu.concatenate %235, %237, %239, %241, %232, %243, %245, %247, %249 in 0 : vector<8x256xf32>, vector<8x256xf32>, vector<8x256xf32>, vector<8x256xf32>, vector<8x256xf32>, vector<8x256xf32>, vector<8x256xf32>, vector<8x256xf32>, vector<8x256xf32> -> vector<72x256xf32>
      %251 = arith.truncf %250 : vector<72x256xf32> to vector<72x256xbf16>
      %252 = arith.truncf %233 : vector<8x72xf32> to vector<8x72xbf16>
      %cst_67 = arith.constant dense<0.000000e+00> : vector<8x256xf32>
      %253 = tpu.matmul %252, %251, %cst_67 {dimension_numbers = #tpu.dot_dimension_numbers<[1], [0], [0], [1], [0, 0, 1, 1], [], []>} : vector<8x72xbf16>, vector<72x256xbf16>, vector<8x256xf32> -> vector<8x256xf32>
      %c0_68 = arith.constant 0 : index
      %c0_69 = arith.constant 0 : index
      %c0_70 = arith.constant 0 : index
      %254 = vector.load %arg2[%c0_68, %c0_69, %c0_70] : memref<1x8x256xf32, #tpu.memory_space<vmem>>, vector<1x8x256xf32>
      %255 = vector.shape_cast %254 : vector<1x8x256xf32> to vector<8x256xf32>
      %256 = arith.addf %253, %255 : vector<8x256xf32>
      %c0_71 = arith.constant 0 : index
      %c0_72 = arith.constant 0 : index
      %c0_73 = arith.constant 0 : index
      %257 = vector.load %arg11[%c0_71, %c0_72, %c0_73] : memref<1x8x256xf32, #tpu.memory_space<vmem>>, vector<1x8x256xf32>
      %258 = vector.shape_cast %257 : vector<1x8x256xf32> to vector<8x256xf32>
      %259 = vector.shape_cast %256 : vector<8x256xf32> to vector<1x8x256xf32>
      tpu.vector_store %arg11[%c0_71, %c0_72, %c0_73], %259 {strides = array<i32>} : memref<1x8x256xf32, #tpu.memory_space<vmem>>, vector<1x8x256xf32>,
    } else {
    }
    return
  }
  func.func @transform_0(%arg0: i32, %arg1: i32) -> (i32, i32, i32) {
    %c0_i32 = arith.constant 0 : i32
    %c0_i32_0 = arith.constant 0 : i32
    %c0_i32_1 = arith.constant 0 : i32
    return %arg0, %c0_i32, %c0_i32_0 : i32, i32, i32
  }
  func.func @transform_1(%arg0: i32, %arg1: i32) -> (i32, i32) {
    %c0_i32 = arith.constant 0 : i32
    %c0_i32_0 = arith.constant 0 : i32
    %c0_i32_1 = arith.constant 0 : i32
    return %c0_i32, %c0_i32_0 : i32, i32
  }
  func.func @transform_2(%arg0: i32, %arg1: i32) -> (i32, i32, i32) {
    %c0_i32 = arith.constant 0 : i32
    %c0_i32_0 = arith.constant 0 : i32
    %c0_i32_1 = arith.constant 0 : i32
    return %arg1, %c0_i32, %c0_i32_0 : i32, i32, i32
  }
  func.func @transform_3(%arg0: i32, %arg1: i32) -> (i32, i32, i32) {
    %c0_i32 = arith.constant 0 : i32
    %c0_i32_0 = arith.constant 0 : i32
    %c0_i32_1 = arith.constant 0 : i32
    return %arg1, %c0_i32, %c0_i32_0 : i32, i32, i32
  }
  func.func @transform_4(%arg0: i32, %arg1: i32) -> (i32, i32, i32) {
    %c0_i32 = arith.constant 0 : i32
    %c0_i32_0 = arith.constant 0 : i32
    %c0_i32_1 = arith.constant 0 : i32
    return %arg1, %c0_i32, %c0_i32_0 : i32, i32, i32
  }
  func.func @transform_5(%arg0: i32, %arg1: i32) -> (i32, i32, i32) {
    %c0_i32 = arith.constant 0 : i32
    %c0_i32_0 = arith.constant 0 : i32
    %c0_i32_1 = arith.constant 0 : i32
    return %arg1, %c0_i32, %c0_i32_0 : i32, i32, i32
  }
  func.func @transform_6(%arg0: i32, %arg1: i32) -> (i32, i32) {
    %c0_i32 = arith.constant 0 : i32
    %c0_i32_0 = arith.constant 0 : i32
    %c0_i32_1 = arith.constant 0 : i32
    return %c0_i32, %c0_i32_0 : i32, i32
  }
  func.func @transform_7(%arg0: i32, %arg1: i32) -> (i32, i32) {
    %c0_i32 = arith.constant 0 : i32
    %c0_i32_0 = arith.constant 0 : i32
    %c0_i32_1 = arith.constant 0 : i32
    return %c0_i32, %c0_i32_0 : i32, i32
  }
  func.func @transform_8(%arg0: i32, %arg1: i32) -> (i32, i32) {
    %c0_i32 = arith.constant 0 : i32
    %c0_i32_0 = arith.constant 0 : i32
    %c0_i32_1 = arith.constant 0 : i32
    return %c0_i32, %c0_i32_0 : i32, i32
  }
  func.func @transform_9(%arg0: i32, %arg1: i32) -> (i32, i32, i32) {
    %c0_i32 = arith.constant 0 : i32
    %c0_i32_0 = arith.constant 0 : i32
    %c0_i32_1 = arith.constant 0 : i32
    return %arg0, %c0_i32, %c0_i32_0 : i32, i32, i32
  }
}

</mosaic_0001>

<bundles_post_ra>
// kernel: tpu_custom_call.1
= control target key start
LH: loop header
LB: loop body
LE: loop exit
PB: predicated region body
PF: predicated region fallthrough
CT: control target
= control target key end

     0   :  { %s2961_s0 = inlined_call_operand.vmem [shape: f32[2,8,256], index: 0, kind: input, shape index: {}]   ;;  %s2962_s1 = inlined_call_operand.hbm [shape: f32[9,256], index: 1, kind: input, shape index: {}]   ;;  %s2963_s2 = inlined_call_operand.hbm [shape: f32[2,8,72], index: 2, kind: input, shape index: {}]   ;;  %s2964_s3 = inlined_call_operand.vmem [shape: f32[2,8,1], index: 3, kind: input, shape index: {}]   ;;  %s2965_s4 = inlined_call_operand.hbm [shape: f32[2,8,72], index: 4, kind: input, shape index: {}]   ;;  %s2966_s5 = inlined_call_operand.vmem [shape: f32[2,8,1], index: 5, kind: input, shape index: {}]   ;;  %s2967_s6 = inlined_call_operand.vmem [shape: f32[8,72], index: 6, kind: input, shape index: {}]   ;;  %s2968_s7 = inlined_call_operand.vmem [shape: f32[2,20], index: 7, kind: input, shape index: {}]   ;;  %s2969_s8 = inlined_call_operand.<no memory space> [shape: f32[1,1], index: 8, kind: input, shape index: {}]   ;;  %s2970_s9 = inlined_call_operand.hbm [shape: f32[2,8,256], index: 9, kind: output, shape index: {}]  }
   0x1   :  { %2983 = sst [smem:[#allocation22_spill]] %s2962_s1 }
   0x2   :  { %2984 = sst [smem:[#allocation23_spill]] %s2963_s2 }
   0x3   :  { %2985 = sst [smem:[#allocation24_spill]] %s2965_s4 }
   0x4   :  { %2986 = sst [smem:[#allocation25_spill]] %s2966_s5 }
   0x5   :  { %2987 = sst [smem:[#allocation26_spill]] %s2967_s6 }
   0x6   :  { %2988 = sst [smem:[#allocation27_spill]] %s2968_s7 }
   0x7   :  { %2989 = sst [smem:[#allocation28_spill]] %s2970_s9 }
   0x8   :  { %14 = sst [smem:[#allocation3]] %s2969_s8 }
   0x9   :  { %15 = vsyncpa [#allocation5], 0 }
   0xa   :  { %16 = vsyncpa [#allocation9], 0 }
   0xb   :  { %18 = vsyncpa [#allocation9 + $0x1], 0 }
   0xc   :  { %19 = vsyncpa [#allocation7], 0 }
   0xd   :  { %20 = vsyncpa [#allocation6], 0 }
   0xe   :  { %22 = vsyncpa [#allocation6 + $0x1], 0  ;;  %s2049_s11 = smov 0   ;;  %s2051_s12 = smov 0  }
   0xf   :  { %s2053_s13 = smov 0   ;;  %s2055_s14 = smov 0  }
  0x10   :  { %s2057_s15 = smov 0   ;;  %s2059_s16 = smov 0  }
  0x11   :  { %s2061_s17 = smov 0   ;;  %s2063_s8 = smov 0  }
  0x12   :  { %s2065_s18 = smov 0   ;;  %s2067_s19 = smov 0  }
  0x13   :  { %s2069_s20 = smov 0  }
  0x14 LB: > { %2990 = sst [smem:[#allocation17_spill]] %s1959_s18  ;;  %s37_s21 = sadd.s32 1, %s1959_s18  ;;  %s1967_s20 = sphi %s2069_s20, %s28_s20   ;;  %s1963_s19 = sphi %s2067_s19, %s3026_s19   ;;  %s1959_s18 = sphi %s2065_s18, %s3025_s18   ;;  %s1955_s8 = sphi %s2063_s8, %s3024_s8   ;;  %s1951_s17 = sphi %s2061_s17, %s3023_s17   ;;  %s1947_s16 = sphi %s2059_s16, %s3032_s16   ;;  %s1943_s15 = sphi %s2057_s15, %s3031_s15   ;;  %s1939_s14 = sphi %s2055_s14, %s3030_s14   ;;  %s1935_s13 = sphi %s2053_s13, %s3029_s13   ;;  %s1931_s12 = sphi %s2051_s12, %s3028_s12   ;;  %s1927_s11 = sphi %s2049_s11, %s3027_s11  }
  0x15   : > { %2991 = sst [smem:[#allocation18_spill]] %s1963_s19  ;;  %s40_s22 = sadd.s32 1, %s1963_s19 }
  0x16   : > { %p38_p0 = scmp.ge.s32.totalorder %s37_s21, 2  ;;  %s94_s23 = sadd.s32 1, %s1947_s16 }
  0x17   : > { %p101_p1 = scmp.ne.s32.totalorder %s1947_s16, %s1943_s15  ;;  %p102_p2 = scmp.eq.s32.totalorder %s1967_s20, 0 }
  0x18   : > { %s3034_s21 = smov (%p38_p0, %s37_s21), 0  ;;  %s3036_s22 = smov (!%p38_p0, %s40_s22), %s1963_s19 }
  0x19   : > { %2992 = sst [smem:[#allocation19_spill]] %s3034_s21  ;;  %s91_s24 = ssub.s32 %s1959_s18, %s3034_s21 }
  0x1a   : > { %p2115_p3 = por %p102_p2, %p101_p1  ;;  %p42_p4 = scmp.ge.s32.totalorder %s3036_s22, 2 }
  0x1b   : > { %p92_p5 = scmp.eq.s32.totalorder %s91_s24, 0  ;;  %p1615_p6 = scmp.lt.s32.totalorder %s1967_s20, 4 }
  0x1c   : > { %s3038_s22 = smov (%p42_p4, %s3036_s22), 0  ;;  %s336_s28 = sand.u32 1, %s1967_s20  }
  0x1d   : > { %2994 = sst [smem:[#allocation20_spill]] %s3038_s22  ;;  %s258_s27 = ssub.s32 %s1963_s19, %s3038_s22 }
  0x1e   : > { %s2123_s26 = scalar_select %p92_p5, %s1947_s16, %s94_s23  }
  0x1f   : > { %p2128_p7 = scmp.eq.s32.totalorder %s258_s27, 0  ;;  %s338_s30 = sand.u32 1, %s1947_s16  }
  0x20   : > { %2995 = sst [smem:[#allocation21_spill]] %s2123_s26  ;;  %s1549_s10 = sshll.u32 %s1959_s18, 7 }
  0x21   : > { %s2134_s21 = sshll.u32 %s338_s30, 3  ;;  %s2997_s2 = sld [smem:[#allocation23_spill]] }
  0x22   : > { %p2141_p8 = pnand %p1615_p6, %p2115_p3  ;;  %s340_s23 = scalar_lea.vmem [#allocation8], %s2134_s21 }
  0x23   : > { %s347_s27 = sshll.u32 %s340_s23, 4  ;;  %s2146_s22 = scalar_lea.sflag [#allocation9], %s336_s28  ;;  %s348_s27 = int_to_ptr.vmem [resolvable:$true] %s347_s27 }
  0x24   : > { %p2977_p9 = pneg %p2141_p8  ;;  %s1755_s30 = scalar_lea.vmem %s348_s27, 128 }
  0x25   : > { %p1756_p10 = scmp.ne.s32.totalorder %s348_s27, %s1755_s30  ;;  %s1969_s6 = smov [#allocation8]  }
  0x26   : > { %s1760_s9 = sshll.u32 %s1969_s6, 4  ;;  %s1761_s9 = int_to_ptr.vmem [resolvable:$false] %s1760_s9 }
  0x27   : > { %s345_s24 = scalar_lea.hbm %s2997_s2, %s1549_s10  ;;  %p1758_p11 = pnand %p1756_p10, %p2977_p9 }
  0x28   : > { %s1762_s25 = scalar_lea.vmem %s1761_s9, 256  ;;  %p1763_p13 = scmp.lt.s32.totalorder %s348_s27, %s1761_s9 }
  0x29   : > { %p1759_p12 = pneg %p1758_p11  ;;  %p1764_p0 = scmp.lt.s32.totalorder %s1762_s25, %s1755_s30 }
  0x2b   : > { %p1765_p1 = por %p1764_p0, %p1763_p13 }
  0x2d   : > { %p1766_p2 = pnand %p1765_p1, %p1759_p12 }
  0x2f   : > { %1769 = shalt.err (!%p1766_p2)
}
  0x30   : > { %1605 = dma.hbm_to_vmem [thread:$0]  (!%p2141_p8), %s345_s24, 128, %s348_s27, %s2146_s22  }
  0x31   : > { %s2999_s4 = sld [smem:[#allocation24_spill]]  ;;  %s2162_s6 = sadd.s32 4294967295, %s1967_s20  }
  0x32   : > { %s1543_s9 = sadd.s32 4294967294, %s1967_s20   ;;  %p107_p3 = scmp.ne.s32.totalorder %s1943_s15, %s1939_s14 }
  0x33   : > { %p2976_p4 = scmp.eq.s32.totalorder %s2162_s6, 0  ;;  %s261_s25 = sadd.s32 1, %s1935_s13 }
  0x34   : > { %s2172_s2 = scalar_select %p2128_p7, %s1935_s13, %s261_s25  }
  0x35   : > { %p2176_p5 = por %p2976_p4, %p107_p3  ;;  %p271_p6 = scmp.ne.s32.totalorder %s1935_s13, %s1931_s12 }
  0x36   : > { %p272_p10 = scmp.eq.s32.totalorder %s2162_s6, 3  ;;  %p277_p11 = scmp.ne.s32.totalorder %s1931_s12, %s1927_s11 }
  0x37   : > { %s2159_s30 = scalar_lea.hbm %s2999_s4, %s1549_s10  ;;  %p278_p12 = scmp.eq.s32.totalorder %s1543_s9, 3 }
  0x38   : > { %s3000_s24 = scalar_select %p2176_p5, 1, 0 }
  0x39   : > { %p1544_p13 = scmp.ge.s32.totalorder %s1967_s20, 1  ;;  %p2186_p0 = por %p272_p10, %p271_p6 }
  0x3a   : > { %p285_p1 = scmp.lt.s32.totalorder %s1967_s20, 5  ;;  %p2191_p2 = por %p278_p12, %p277_p11 }
  0x3b   : > { %s3001_s10 = scalar_select %p2186_p0, 1, 0 }
  0x3c   : > { %s3002_s14 = scalar_select %p2191_p2, 1, 0 }
  0x3d   : > { %p2195_p7 = pnand %p1544_p13, %p285_p1  ;;  %s1970_s27 = smov [#allocation4]  }
  0x3e   : > { %s297_s28 = sshll.u32 %s1970_s27, 4  ;;  %s3004_s7 = sld [smem:[#allocation27_spill]]  ;;  %s298_s28 = int_to_ptr.vmem [resolvable:$true] %s297_s28 }
  0x3f   : > { %p1595_p3 = pneg %p2195_p7  ;;  %s365_s19 = scalar_lea.vmem [#allocation10], %s2134_s21 }
  0x40   : > { %s372_s18 = sshll.u32 %s365_s19, 4  ;;  %s1781_s27 = scalar_lea.vmem %s298_s28, 512  ;;  %s2211_s18 = int_to_ptr.vmem [resolvable:$true] %s372_s18 }
  0x41   : > { %p2206_p6 = pnand %p1595_p3, %p2976_p4  ;;  %p1782_p11 = scmp.ne.s32.totalorder %s298_s28, %s1781_s27 }
  0x42   : > { %p1789_p1 = scmp.lt.s32.totalorder %s298_s28, %s298_s28  ;;  %p1790_p3 = scmp.lt.s32.totalorder %s1781_s27, %s1781_s27 }
  0x43   : > { %p1772_p10 = pneg %p2206_p6 }
  0x44   : > { %s314_s25 = sshll.u32 %s3004_s7, 4  ;;  %p1791_p4 = por %p1790_p3, %p1789_p1  ;;  %s315_s25 = int_to_ptr.vmem [resolvable:$true] %s314_s25 }
  0x45   : > { %p1784_p12 = pnand %p1782_p11, %p1772_p10 }
  0x47   : > { %p1785_p13 = pneg %p1784_p12 }
  0x49   : > { %p1792_p9 = pnand %p1791_p4, %p1785_p13 }
  0x4b   : > { %1795 = shalt.err (!%p1792_p9)
}
  0x4c   : > { %s1971_s23 = smov 256   ;;  %s1972_s21 = smov 16  }
  0x4d   : > { %s3006_s1 = sld [smem:[#allocation22_spill]]  ;;  %s1796_s7 = scalar_lea.vmem %s315_s25, 32 }
  0x4e   : > { %p1797_p2 = scmp.ne.s32.totalorder %s315_s25, %s1796_s7  ;;  %p1804_p0 = scmp.lt.s32.totalorder %s315_s25, %s315_s25 }
  0x4f   : > { %p1805_p5 = scmp.lt.s32.totalorder %s1796_s7, %s1796_s7 }
  0x50   : > { %p1799_p11 = pnand %p1797_p2, %p1772_p10 }
  0x51   : > { %p1806_p1 = por %p1805_p5, %p1804_p0 }
  0x52   : > { %p1800_p12 = pneg %p1799_p11 }
  0x53   : > { %1598 = dma.hbm_to_vmem [thread:$0]  (!%p2206_p6), %s3006_s1, 512, %s298_s28, [#allocation5], %s1971_s23, %s1971_s23, %s1972_s21  }
  0x54   : > { %p1807_p4 = pnand %p1806_p1, %p1800_p12 }
  0x56   : > { %1810 = shalt.err (!%p1807_p4)
}
  0x57   : > { %s1973_s27 = smov [#allocation11]   ;;  %s1824_s28 = scalar_lea.vmem %s2211_s18, 128 }
  0x58   : > { %1601 = dma.vmem_to_smem (!%p2206_p6), %s315_s25, 32, %s1973_s27, [#allocation7]  }
  0x59   : > { %p1825_p9 = scmp.ne.s32.totalorder %s2211_s18, %s1824_s28  ;;  %p3007_p13 = pneg %p2141_p8 }
  0x5a   : > { %s1974_s23 = smov [#allocation10]  }
  0x5b   : > { %p1827_p3 = pnand %p1825_p9, %p3007_p13  ;;  %s1829_s21 = sshll.u32 %s1974_s23, 4  ;;  %s1830_s21 = int_to_ptr.vmem [resolvable:$false] %s1829_s21 }
  0x5c   : > { %s1831_s7 = scalar_lea.vmem %s1830_s21, 256  ;;  %p1832_p5 = scmp.lt.s32.totalorder %s2211_s18, %s1830_s21 }
  0x5d   : > { %p1828_p2 = pneg %p1827_p3  ;;  %p1833_p0 = scmp.lt.s32.totalorder %s1831_s7, %s1824_s28 }
  0x5f   : > { %p1834_p10 = por %p1833_p0, %p1832_p5 }
  0x61   : > { %p1835_p11 = pnand %p1834_p10, %p1828_p2 }
  0x63   : > { %1838 = shalt.err (!%p1835_p11)
}
  0x64   : > { %1608 = dma.hbm_to_vmem [thread:$0]  (!%p2141_p8), %s2159_s30, 128, %s2211_s18, %s2146_s22  }
  0x65   : > { %388 = sbr.rel (%p2195_p7) target bundleno = 1769 (0x6e9), region = 56  ;;  %p3008_p6 = scmp.eq.s32.totalorder (!%p2195_p7), %s2162_s6, 0 }
  0x6a   : > { %1910 = dma.done.wait (%p3008_p6), [#allocation5], 512   ;;  %p3009_p12 = pmov %p3008_p6 }
  0x6b   : > { %s394_s4 = sand.u32 1, %s2162_s6   ;;  %s396_s25 = sand.u32 1, %s1943_s15  }
  0x6c   : > { %1912 = vsyncadd (%p3009_p12), [#allocation5], 4294966784  ;;  %s2247_s19 = sshll.u32 %s396_s25, 3  ;;  %s395_s5 = scalar_lea.sflag [#allocation9], %s394_s4 }
  0x6d   : > { %p3010_p8 = scmp.ne.s32.totalorder %s3000_s24, 0 }
  0x6f   : > { %1914 = dma.done.wait (%p3010_p8), %s395_s5, 256  }
  0x70   : > { %1916 = vsyncadd (%p3010_p8), %s395_s5, 4294967040  ;;  %p3011_p7 = pmov %p3008_p6 }
  0x71   : > { %p3012_p1 = pmov %p3008_p6 }
  0x72   : > { %1918 = dma.done.wait (%p3011_p7), [#allocation7], 32  }
  0x73   : > { %1920 = vsyncadd (%p3012_p1), [#allocation7], 4294967264 }
  0x74   : > { %416 = sfence }
  0x75   : > { %s2980_s22 = sand.u32 1, %s1931_s12   ;;  %p465_p4 = scmp.lt.s32.totalorder %s1955_s8, 1 }
  0x76   : > { %s1557_s30 = sshll.u32 %s2980_s22, 4  ;;  %p470_p9 = scmp.lt.s32.totalorder %s1951_s17, 1 }
  0x77   : > { %s2264_s24 = sld [smem:[#allocation3]]  ;;  %s2283_s26 = scalar_lea.vmem [#allocation12], %s1557_s30 }
  0x78   : > { %s466_s29 = scalar_select %p465_p4, %s1955_s8, 1 }
  0x79   : > { %s471_s27 = scalar_select %p470_p9, %s1951_s17, 1 }
  0x7a   : > { %s1579_s28 = sshll.u32 %s466_s29, 4  ;;  %s3013_s22 = sld [smem:[#allocation25_spill]] }
  0x7b   : > { %s2271_s21 = scalar_lea.vmem %s2961_s0, %s1579_s28  ;;  %s1560_s7 = sshll.u32 %s471_s27, 3 }
  0x7c   : > { %s2276_s5 = scalar_lea.vmem %s2964_s3, %s1560_s7  ;;  %p1562_p13 = scmp.ne.s32.totalorder %s1951_s17, 0 }
  0x7e   : > { %483 = sbr.rel (%p1562_p13) target bundleno = 133 (0x85), region = 76 }
  0x80   : > { %s2281_s1 = scalar_lea.vmem %s3013_s22, %s1560_s7 }
  0x83   : > { %v484_v0 = vld [vmem:[%s2271_s21] sm:$0xff]  ;;  %v485_v1 = vld [vmem:[%s2271_s21 + $0x8] sm:$0xff] }
  0x84   : > { %486 = vst [vmem:[#allocation2] sm:$0xff] %v484_v0  ;;  %487 = vst [vmem:[#allocation2 + $0x8] sm:$0xff] %v485_v1 }
  0x85 PF: > { %s1975_s29 = smov 113   ;;  %s2981_s9 = smov 111   ;;  %v1981_v4 = vmov 0   ;;  %v559_v5 = vld [vmem:[%s2276_s5] sm:$0xff]  ;;  %v492_v6 = vlaneseq  ;;  %v2334_v11 = vld [vmem:[#allocation4 + $0x18] sm:$0x1] }
  0x86   : > { %s1977_s18 = smov 112   ;;  %s1978_s22 = smov 127   ;;  %693 = vmatprep.mubr.bf16.mxu0 %v1981_v4  ;;  %1731 = vset.pattern.permute.xlu0 %v1981_v4  ;;  %v2332_v10 = vld [vmem:[#allocation4 + $0x10] sm:$0x1]  ;;  %v2337_v15 = vld [vmem:[#allocation4] sm:$0xff]  ;;  %v2340_v17 = vld [vmem:[#allocation4 + $0x8] sm:$0xff] }
  0x87   : > { %s1979_s30 = smov 15   ;;  %s1980_s27 = smov 1   ;;  %832 = vmatprep.mubr.bf16.mxu1 %v1981_v4  ;;  %v2325_v7 = vshrl.u32 %v492_v6, 7  ;;  %v2327_v8 = vand.u32 127, %v492_v6  ;;  %vm654_vm3 = vcmask 1043456   ;;  %vm650_vm9 = vcmask 588800  }
  0x88   : > { %s1982_s28 = smov 17   ;;  %s1983_s23 = smov 16   ;;  %vm841_vm12 = vcmask 64512  }
  0x89   : > { %v2330_v9 = vsub.s32 0, %v2325_v7  ;;  %v534_v14 = vsub.s32 6, %v2325_v7  ;;  %v542_v16 = vsub.s32 7, %v2325_v7  ;;  %vm629_vm0 = vcmp.lt.s32.totalorder %v2327_v8, 111  ;;  %s3014_s6 = scalar_lea.vmem [#allocation8], %s2247_s19  ;;  %p1571_p3 = scmp.ne.s32.totalorder %s1951_s17, 1 }
  0x8a   : > { %vm611_vm1 = vcmp.lt.s32.totalorder %v2327_v8, 113  ;;  %vm620_vm2 = vcmp.lt.s32.totalorder %v2327_v8, 112  ;;  %v526_v23 = vsub.s32 5, %v2325_v7  ;;  %vm602_vm4 = vcmp.lt.s32.totalorder %v2327_v8, 127 }
  0x8b   : > { %v2288_v2 = vld [vmem:[#allocation2] sm:$0xff]  ;;  %v2294_v3 = vld [vmem:[#allocation2 + $0x8] sm:$0xff]  ;;  %v2344_v18 = vrot.slane %v2332_v10, %v2330_v9  ;;  %v2349_v19 = vrot.slane %v2334_v11, %v2330_v9  ;;  %v2353_v21 = vrot.slane %v2337_v15, %v534_v14  ;;  %v2358_v24 = vrot.slane %v2340_v17, %v534_v14 }
  0x8c   : > { %607 = vrot.lane.b32.xlu1 %v2288_v2, %s1975_s29  ;;  %625 = vrot.lane.b32.xlu0 %v2288_v2, %s2981_s9  ;;  %v2365_v27 = vrot.slane %v2337_v15, %v542_v16  ;;  %v2371_v30 = vrot.slane %v2340_v17, %v542_v16  ;;  %v2377_v37 = vrot.slane %v2337_v15, %v526_v23  ;;  %v510_v54 = vsub.s32 2, %v2325_v7 }
  0x8d   : > { %v2386_v41 = vrot.slane %v2340_v17, %v526_v23  ;;  %v518_v55 = vsub.s32 3, %v2325_v7  ;;  %vm584_vm5 = vcmp.lt.s32.totalorder %v2327_v8, 15  ;;  %vm593_vm6 = vcmp.lt.s32.totalorder %v2327_v8, 1 }
  0x8e   : > { %v2406_v60 = vrot.slane %v2337_v15, %v510_v54  ;;  %v2409_v61 = vrot.slane %v2340_v17, %v510_v54  ;;  %v502_v6 = vsub.s32 1, %v2325_v7  ;;  %vm566_vm7 = vcmp.lt.s32.totalorder %v2327_v8, 17 }
  0x8f   : > { %v2412_v62 = vrot.slane %v2337_v15, %v518_v55  ;;  %v2415_v63 = vrot.slane %v2340_v17, %v518_v55  ;;  %v2437_v7 = vrot.slane %v2340_v17, %v2330_v9  ;;  %vm575_vm8 = vcmp.lt.s32.totalorder %v2327_v8, 16 }
  0x90   : > { %609 = vrot.lane.b32.xlu1 %v2294_v3, %s1975_s29  ;;  %627 = vrot.lane.b32.xlu0 %v2294_v3, %s2981_s9 }
  0x94   : > { %618 = vrot.lane.b32.xlu1 %v2294_v3, %s1977_s18  ;;  %616 = vrot.lane.b32.xlu0 %v2288_v2, %s1977_s18 }
  0x98   : > { %600 = vrot.lane.b32.xlu1 %v2294_v3, %s1978_s22  ;;  %598 = vrot.lane.b32.xlu0 %v2288_v2, %s1978_s22 }
  0x9c   : > { %582 = vrot.lane.b32.xlu1 %v2294_v3, %s1979_s30  ;;  %580 = vrot.lane.b32.xlu0 %v2288_v2, %s1979_s30 }
  0xa0   : > { %591 = vrot.lane.b32.xlu1 %v2294_v3, %s1980_s27  ;;  %589 = vrot.lane.b32.xlu0 %v2288_v2, %s1980_s27 }
  0xa4   : > { %562 = vrot.lane.b32.xlu1 %v2294_v3, %s1982_s28  ;;  %560 = vrot.lane.b32.xlu0 %v2288_v2, %s1982_s28 }
  0xa8   : > { %573 = vrot.lane.b32.xlu1 %v2294_v3, %s1983_s23  ;;  %571 = vrot.lane.b32.xlu0 %v2288_v2, %s1983_s23 }
  0xac   : > { %647 = vperm.xlu0 %1731, %v559_v5  }
  0xfe   : > { %v608_v12 = vpop.permute.xlu1 %607  ;;  %v626_v13 = vpop.permute.xlu0 %625 }
 0x102   : > { %v610_v20 = vpop.permute.xlu1 %609  ;;  %v628_v22 = vpop.permute.xlu0 %627 }
 0x103   : > { %v630_v25 = vsel %vm629_vm0, %v626_v13, %v628_v22  ;;  %v631_v26 = vsel %vm629_vm0, %v628_v22, %v626_v13  ;;  %v612_v28 = vsel %vm611_vm1, %v608_v12, %v610_v20  ;;  %v613_v32 = vsel %vm611_vm1, %v610_v20, %v608_v12 }
 0x104   : > { %v632_v29 = vmul.f32 %v630_v25, %v2344_v18  ;;  %v633_v31 = vmul.f32 %v631_v26, %v2349_v19  ;;  %v614_v38 = vmul.f32 %v612_v28, %v2353_v21  ;;  %v615_v42 = vmul.f32 %v613_v32, %v2358_v24 }
 0x105   : > { %v2433_v26 = vrot.slane %v2337_v15, %v2330_v9  ;;  %v2440_v28 = vrot.slane %v2337_v15, %v502_v6 }
 0x106   : > { %v619_v33 = vpop.permute.xlu1 %618  ;;  %v617_v34 = vpop.permute.xlu0 %616  ;;  %v643_v35 = vpack.c.bf16 %v633_v31, %v633_v31  ;;  %v642_v36 = vpack.c.bf16 %v632_v29, %v632_v29  ;;  %v2443_v29 = vrot.slane %v2340_v17, %v502_v6 }
 0x107   : > { %v621_v39 = vsel %vm620_vm2, %v617_v34, %v619_v33  ;;  %v622_v40 = vsel %vm620_vm2, %v619_v33, %v617_v34 }
 0x108   : > { %v623_v43 = vmul.f32 %v621_v39, %v2365_v27  ;;  %v624_v44 = vmul.f32 %v622_v40, %v2371_v30  ;;  %1563 = vmatprep.subr.msk.bf16.mxu0 %vm654_vm3, %v643_v35  ;;  %v656_v45 = vsel %vm654_vm3, %v642_v36, 0 }
 0x109   : > { %668 = vmatpush1.bf16.msra.mxu0 %v656_v45 }
 0x10a   : > { %v601_v46 = vpop.permute.xlu1 %600  ;;  %v599_v47 = vpop.permute.xlu0 %598  ;;  %v641_v48 = vpack.c.bf16 %v624_v44, %v615_v42  ;;  %v640_v49 = vpack.c.bf16 %v623_v43, %v614_v38  ;;  %v558_v43 = vld [vmem:[%s3014_s6] sm:$0xff] }
 0x10b   : > { %v603_v50 = vsel %vm602_vm4, %v599_v47, %v601_v46  ;;  %v604_v51 = vsel %vm602_vm4, %v601_v46, %v599_v47  ;;  %v644_v46 = vpack.c.bf16 %v558_v43, %v558_v43 }
 0x10c   : > { %v605_v52 = vmul.f32 %v603_v50, %v2377_v37  ;;  %v606_v53 = vmul.f32 %v604_v51, %v2386_v41  ;;  %669 = vmatprep.subr.bf16.mxu0 %v641_v48 }
 0x10d   : > { %670 = vmatpush1.bf16.msra.mxu0 %v640_v49  ;;  %v704_v49 = vstv %s2264_s24 }
 0x10e   : > { %v583_v56 = vpop.permute.xlu1 %582  ;;  %v581_v57 = vpop.permute.xlu0 %580  ;;  %v639_v58 = vpack.c.bf16 %v606_v53, %v2294_v3  ;;  %v638_v59 = vpack.c.bf16 %v605_v52, %v2288_v2 }
 0x10f   : > { %v585_v0 = vsel %vm584_vm5, %v581_v57, %v583_v56  ;;  %v586_v1 = vsel %vm584_vm5, %v583_v56, %v581_v57 }
 0x110   : > { %671 = vmatprep.subr.bf16.mxu0 %v639_v58  ;;  %v587_v12 = vmul.f32 %v586_v1, %v2406_v60  ;;  %v588_v13 = vmul.f32 %v585_v0, %v2409_v61 }
 0x111   : > { %672 = vmatpush1.bf16.msra.mxu0 %v638_v59  ;;  %v710_v59 = vld [vmem:[%s2281_s1] sm:$0xff]  ;;  %s3015_s1 = scalar_lea.vmem [#allocation10], %s2247_s19  ;;  %s2586_s19 = sshll.u32 %s1951_s17, 7 }
 0x112   : > { %v592_v2 = vpop.permute.xlu1 %591  ;;  %v590_v3 = vpop.permute.xlu0 %589  ;;  %s1011_s24 = sadd.s32 1, %s2586_s19  ;;  %s2590_s7 = sld [smem:[#allocation11 + %s2586_s19]] }
 0x113   : > { %v594_v4 = vsel %vm593_vm6, %v590_v3, %v592_v2  ;;  %v595_v5 = vsel %vm593_vm6, %v592_v2, %v590_v3  ;;  %s2592_s4 = sld [smem:[#allocation11 + %s1011_s24]]  ;;  %s1018_s25 = sadd.s32 2, %s2586_s19 }
 0x114   : > { %v596_v14 = vmul.f32 %v595_v5, %v2412_v62  ;;  %v597_v16 = vmul.f32 %v594_v4, %v2415_v63  ;;  %s1025_s5 = sadd.s32 3, %s2586_s19  ;;  %s2596_s6 = sld [smem:[#allocation11 + %s1018_s25]] }
 0x115   : > { %s1053_s25 = sadd.s32 7, %s2586_s19  ;;  %s1990_s17 = smov (!%p1571_p3), 15  }
 0x116   : > { %v563_v20 = vpop.permute.xlu1 %562  ;;  %v561_v22 = vpop.permute.xlu0 %560  ;;  %v637_v23 = vpack.c.bf16 %v597_v16, %v588_v13  ;;  %v636_v25 = vpack.c.bf16 %v596_v14, %v587_v12 }
 0x117   : > { %v567_v31 = vsel %vm566_vm7, %v561_v22, %v563_v20  ;;  %v568_v32 = vsel %vm566_vm7, %v563_v20, %v561_v22 }
 0x118   : > { %673 = vmatprep.subr.bf16.mxu0 %v637_v23  ;;  %v569_v38 = vmul.f32 %v568_v32, %v2433_v26  ;;  %v570_v39 = vmul.f32 %v567_v31, %v2437_v7 }
 0x119   : > { %674 = vmatpush1.bf16.msra.mxu0 %v636_v25 }
 0x11a   : > { %v574_v33 = vpop.permute.xlu1 %573  ;;  %v572_v34 = vpop.permute.xlu0 %571 }
 0x11b   : > { %v576_v35 = vsel %vm575_vm8, %v572_v34, %v574_v33  ;;  %v577_v36 = vsel %vm575_vm8, %v574_v33, %v572_v34 }
 0x11c   : > { %v578_v40 = vmul.f32 %v577_v36, %v2440_v28  ;;  %v579_v42 = vmul.f32 %v576_v35, %v2443_v29 }
 0x11e   : > { %v635_v44 = vpack.c.bf16 %v579_v42, %v570_v39  ;;  %v634_v45 = vpack.c.bf16 %v578_v40, %v569_v38 }
 0x120   : > { %675 = vmatprep.subr.bf16.mxu0 %v635_v44 }
 0x121   : > { %676 = vmatpush1.bf16.msra.mxu0 %v634_v45 }
 0x124   : > { %1564 = vmatmul.mubr.msk.bf16.vlgmr.msra.gmra.mxu0 %vm650_vm9, %v644_v46 }
 0x127   : > { %v648_v47 = vpop.permute.xlu0 %647 }
 0x1e4   : > { %v695_v48 = vpop.f32.mrf.mxu0 }
 0x1e5   : > { %v696_v50 = vadd.f32 %v695_v48, %v648_v47 }
 0x1e6   : > { %v697_v51 = vpop.f32.mrf.mxu0 }
 0x1e7   : > { %vm702_vm10 = vcmp.ge.f32.partialorder %v696_v50, 0.0  ;;  %v705_v52 = vmul.f32 %v704_v49, %v696_v50  ;;  %v698_v53 = vadd.f32 %v697_v51, %v648_v47 }
 0x1e8   : > { %v699_v54 = vpop.f32.mrf.mxu0 }
 0x1e9   : > { %v2462_v55 = vsel %vm702_vm10, %v696_v50, %v705_v52  ;;  %v706_v56 = vmul.f32 %v704_v49, %v698_v53  ;;  %vm703_vm11 = vcmp.ge.f32.partialorder %v698_v53, 0.0 }
 0x1ea   : > { %v700_v57 = vpop.f32.mrf.mxu0  ;;  %751 = vrot.lane.b32.xlu0 %v2462_v55, %s1975_s29  ;;  %767 = vrot.lane.b32.xlu1 %v2462_v55, %s2981_s9 }
 0x1eb   : > { %v708_v58 = vsel %vm703_vm11, %v698_v53, %v706_v56 }
 0x1ee   : > { %759 = vrot.lane.b32.xlu0 %v2462_v55, %s1977_s18  ;;  %769 = vrot.lane.b32.xlu1 %v708_v58, %s2981_s9 }
 0x1f2   : > { %743 = vrot.lane.b32.xlu0 %v2462_v55, %s1978_s22  ;;  %753 = vrot.lane.b32.xlu1 %v708_v58, %s1975_s29 }
 0x1f6   : > { %727 = vrot.lane.b32.xlu0 %v2462_v55, %s1979_s30  ;;  %761 = vrot.lane.b32.xlu1 %v708_v58, %s1977_s18 }
 0x1fa   : > { %735 = vrot.lane.b32.xlu0 %v2462_v55, %s1980_s27  ;;  %745 = vrot.lane.b32.xlu1 %v708_v58, %s1978_s22 }
 0x1fe   : > { %711 = vrot.lane.b32.xlu0 %v2462_v55, %s1982_s28  ;;  %729 = vrot.lane.b32.xlu1 %v708_v58, %s1979_s30 }
 0x202   : > { %719 = vrot.lane.b32.xlu0 %v2462_v55, %s1983_s23  ;;  %737 = vrot.lane.b32.xlu1 %v708_v58, %s1980_s27 }
 0x206   : > { %788 = vperm.xlu0 %1731, %v710_v59   ;;  %713 = vrot.lane.b32.xlu1 %v708_v58, %s1982_s28 }
 0x20a   : > { %721 = vrot.lane.b32.xlu1 %v708_v58, %s1983_s23 }
 0x25c   : > { %v752_v0 = vpop.permute.xlu0 %751  ;;  %v768_v1 = vpop.permute.xlu1 %767 }
 0x260   : > { %v760_v2 = vpop.permute.xlu0 %759  ;;  %v770_v3 = vpop.permute.xlu1 %769 }
 0x261   : > { %v771_v4 = vsel %vm629_vm0, %v768_v1, %v770_v3  ;;  %v772_v5 = vsel %vm629_vm0, %v770_v3, %v768_v1 }
 0x262   : > { %v773_v6 = vmul.f32 %v771_v4, %v2344_v18  ;;  %v774_v12 = vmul.f32 %v772_v5, %v2349_v19 }
 0x264   : > { %v744_v13 = vpop.permute.xlu0 %743  ;;  %v754_v14 = vpop.permute.xlu1 %753  ;;  %v784_v16 = vpack.c.bf16 %v774_v12, %v774_v12  ;;  %v783_v20 = vpack.c.bf16 %v773_v6, %v773_v6 }
 0x265   : > { %v755_v23 = vsel %vm611_vm1, %v752_v0, %v754_v14  ;;  %v756_v25 = vsel %vm611_vm1, %v754_v14, %v752_v0 }
 0x266   : > { %1565 = vmatprep.subr.msk.bf16.mxu1 %vm654_vm3, %v784_v16  ;;  %v795_v22 = vsel %vm654_vm3, %v783_v20, 0  ;;  %v757_v34 = vmul.f32 %v755_v23, %v2353_v21  ;;  %v758_v35 = vmul.f32 %v756_v25, %v2358_v24 }
 0x267   : > { %807 = vmatpush1.bf16.msra.mxu1 %v795_v22 }
 0x268   : > { %v762_v31 = vpop.permute.xlu1 %761  ;;  %v728_v36 = vpop.permute.xlu0 %727 }
 0x269   : > { %v763_v32 = vsel %vm620_vm2, %v760_v2, %v762_v31  ;;  %v764_v33 = vsel %vm620_vm2, %v762_v31, %v760_v2  ;;  %v709_v31 = vld [vmem:[%s3015_s1] sm:$0xff]  ;;  %s2600_s1 = sld [smem:[#allocation11 + %s1025_s5]] }
 0x26a   : > { %v765_v38 = vmul.f32 %v763_v32, %v2365_v27  ;;  %v766_v39 = vmul.f32 %v764_v33, %v2371_v30 }
 0x26c   : > { %v746_v40 = vpop.permute.xlu1 %745  ;;  %v782_v42 = vpack.c.bf16 %v766_v39, %v758_v35  ;;  %v781_v43 = vpack.c.bf16 %v765_v38, %v757_v34  ;;  %v736_v48 = vpop.permute.xlu0 %735  ;;  %v785_v34 = vpack.c.bf16 %v709_v31, %v709_v31  ;;  %v1984_v35 = vmov 0.0  }
 0x26d   : > { %v747_v44 = vsel %vm602_vm4, %v744_v13, %v746_v40  ;;  %v748_v45 = vsel %vm602_vm4, %v746_v40, %v744_v13  ;;  %909 = vmatprep.mubr.f32.mxu0 %v1984_v35  ;;  %v1020_v31 = vstv %s2596_s6  ;;  %s2657_s6 = sld [smem:[#allocation11 + %s1053_s25]] }
 0x26e   : > { %v749_v46 = vmul.f32 %v747_v44, %v2377_v37  ;;  %v750_v47 = vmul.f32 %v748_v45, %v2386_v41  ;;  %808 = vmatprep.subr.bf16.mxu1 %v782_v42  ;;  %v1985_v45 = vmov 0.125  }
 0x26f   : > { %809 = vmatpush1.bf16.msra.mxu1 %v781_v43 }
 0x270   : > { %v730_v49 = vpop.permute.xlu1 %729  ;;  %v780_v50 = vpack.c.bf16 %v750_v47, %v708_v58  ;;  %v779_v51 = vpack.c.bf16 %v749_v46, %v2462_v55  ;;  %v712_v59 = vpop.permute.xlu0 %711 }
 0x271   : > { %v731_v52 = vsel %vm584_vm5, %v728_v36, %v730_v49  ;;  %v732_v53 = vsel %vm584_vm5, %v730_v49, %v728_v36 }
 0x272   : > { %810 = vmatprep.subr.bf16.mxu1 %v780_v50  ;;  %v733_v58 = vmul.f32 %v732_v53, %v2406_v60  ;;  %v734_v55 = vmul.f32 %v731_v52, %v2409_v61  ;;  %v933_v52 = vrot.slane %v2340_v17, 1 }
 0x273   : > { %811 = vmatpush1.bf16.msra.mxu1 %v779_v51  ;;  %v932_v51 = vrot.slane %v2337_v15, 1 }
 0x274   : > { %v738_v54 = vpop.permute.xlu1 %737  ;;  %v720_v12 = vpop.permute.xlu0 %719 }
 0x275   : > { %v739_v56 = vsel %vm593_vm6, %v736_v48, %v738_v54  ;;  %v740_v57 = vsel %vm593_vm6, %v738_v54, %v736_v48 }
 0x276   : > { %v741_v0 = vmul.f32 %v740_v57, %v2412_v62  ;;  %v742_v1 = vmul.f32 %v739_v56, %v2415_v63 }
 0x278   : > { %v714_v2 = vpop.permute.xlu1 %713  ;;  %v778_v3 = vpack.c.bf16 %v742_v1, %v734_v55  ;;  %v777_v4 = vpack.c.bf16 %v741_v0, %v733_v58  ;;  %v944_v55 = vrot.slane %v2337_v15, 2  ;;  %v945_v0 = vrot.slane %v2340_v17, 2 }
 0x279   : > { %v715_v5 = vsel %vm566_vm7, %v712_v59, %v714_v2  ;;  %v716_v6 = vsel %vm566_vm7, %v714_v2, %v712_v59  ;;  %v1008_v1 = vstv %s2590_s7  ;;  %v1013_v2 = vstv %s2592_s4  ;;  %s1046_s7 = sadd.s32 6, %s2586_s19 }
 0x27a   : > { %812 = vmatprep.subr.bf16.mxu1 %v778_v3  ;;  %v717_v20 = vmul.f32 %v716_v6, %v2433_v26  ;;  %v718_v22 = vmul.f32 %v715_v5, %v2437_v7  ;;  %s2651_s5 = sld [smem:[#allocation11 + %s1046_s7]] }
 0x27b   : > { %813 = vmatpush1.bf16.msra.mxu1 %v777_v4 }
 0x27c   : > { %v722_v13 = vpop.permute.xlu1 %721 }
 0x27d   : > { %v723_v14 = vsel %vm575_vm8, %v720_v12, %v722_v13  ;;  %v724_v16 = vsel %vm575_vm8, %v722_v13, %v720_v12 }
 0x27e   : > { %v725_v23 = vmul.f32 %v724_v16, %v2440_v28  ;;  %v726_v25 = vmul.f32 %v723_v14, %v2443_v29 }
 0x280   : > { %v776_v32 = vpack.c.bf16 %v726_v25, %v718_v22  ;;  %v775_v33 = vpack.c.bf16 %v725_v23, %v717_v20  ;;  %v956_v23 = vrot.slane %v2337_v15, 3  ;;  %v957_v25 = vrot.slane %v2340_v17, 3 }
 0x281   : > { %v789_v38 = vpop.permute.xlu0 %788 }
 0x282   : > { %814 = vmatprep.subr.bf16.mxu1 %v776_v32 }
 0x283   : > { %815 = vmatpush1.bf16.msra.mxu1 %v775_v33 }
 0x286   : > { %1566 = vmatmul.mubr.msk.bf16.vlgmr.msra.gmra.mxu1 %vm650_vm9, %v785_v34  ;;  %v1027_v34 = vstv %s2600_s1  ;;  %s1060_s1 = sadd.s32 8, %s2586_s19 }
 0x346   : > { %v834_v36 = vpop.f32.mrf.mxu1 }
 0x347   : > { %v2545_v42 = vadd.f32 %v834_v36, %v789_v38 }
 0x348   : > { %v836_v39 = vpop.f32.mrf.mxu1 }
 0x349   : > { %v2543_v40 = vadd.f32 %v836_v39, %v789_v38 }
 0x34a   : > { %v838_v43 = vpop.f32.mrf.mxu1 }
 0x34b   : > { %875 = vmatprep.subr.mxu0 %v2543_v40 }
 0x34c   : > { %v839_v44 = vpop.f32.mrf.mxu1  ;;  %876 = vmatpush1.msra.mxu0 %v2545_v42 }
 0x34d   : > { %1567 = vmatmul.mubr.msk.f32.vlgmr.msra.gmra.mxu0 %vm841_vm12, %v1985_v45 }
 0x40d   : > { %v2549_v46 = vpop.f32.mrf.mxu0 }
 0x40e   : > { %916 = vrot.lane.b32.xlu1 %v2549_v46, %s1982_s28 }
 0x40f   : > { %v2553_v47 = vpop.f32.mrf.mxu0 }
 0x410   : > { %918 = vrot.lane.b32.xlu0 %v2553_v47, %s1982_s28 }
 0x412   : > { %924 = vrot.lane.b32.xlu1 %v2549_v46, %s1983_s23 }
 0x414   : > { %926 = vrot.lane.b32.xlu0 %v2553_v47, %s1983_s23 }
 0x416   : > { %938 = vrot.lane.b32.xlu1 %v2549_v46, %s1979_s30 }
 0x418   : > { %940 = vrot.lane.b32.xlu0 %v2553_v47, %s1979_s30 }
 0x41a   : > { %950 = vrot.lane.b32.xlu1 %v2549_v46, %s1980_s27 }
 0x41c   : > { %952 = vrot.lane.b32.xlu0 %v2553_v47, %s1980_s27 }
 0x41e   : > { %962 = vrot.lane.b32.xlu1 %v2549_v46, %s1978_s22 }
 0x420   : > { %964 = vrot.lane.b32.xlu0 %v2553_v47, %s1978_s22 }
 0x422   : > { %974 = vrot.lane.b32.xlu1 %v2549_v46, %s1975_s29 }
 0x424   : > { %976 = vrot.lane.b32.xlu0 %v2553_v47, %s1975_s29 }
 0x426   : > { %986 = vrot.lane.b32.xlu1 %v2549_v46, %s1977_s18 }
 0x428   : > { %988 = vrot.lane.b32.xlu0 %v2553_v47, %s1977_s18 }
 0x42a   : > { %998 = vrot.lane.b32.xlu1 %v2549_v46, %s2981_s9 }
 0x42c   : > { %1000 = vrot.lane.b32.xlu0 %v2553_v47, %s2981_s9  ;;  %s1032_s9 = sadd.s32 4, %s2586_s19 }
 0x42d   : > { %s2613_s24 = sld [smem:[#allocation11 + %s1032_s9]]  ;;  %s1039_s9 = sadd.s32 5, %s2586_s19 }
 0x42e   : > { %s2641_s4 = sld [smem:[#allocation11 + %s1039_s9]]  ;;  %s1067_s9 = sadd.s32 9, %s2586_s19 }
 0x42f   : > { %s1068_s7 = sld [smem:[#allocation11 + %s1067_s9]] }
 0x480   : > { %v917_v48 = vpop.permute.xlu1 %916 }
 0x482   : > { %v919_v49 = vpop.permute.xlu0 %918 }
 0x483   : > { %v920_v57 = vsel %vm566_vm7, %v917_v48, %v919_v49  ;;  %v921_v59 = vsel %vm566_vm7, %v919_v49, %v917_v48 }
 0x484   : > { %v925_v50 = vpop.permute.xlu1 %924  ;;  %v922_v6 = vmul.f32 %v921_v59, %v2337_v15  ;;  %v923_v12 = vmul.f32 %v920_v57, %v2340_v17 }
 0x486   : > { %v927_v53 = vpop.permute.xlu0 %926  ;;  %v1009_v36 = vmul.f32 %v1008_v1, %v922_v6  ;;  %v1010_v38 = vmul.f32 %v1008_v1, %v923_v12 }
 0x487   : > { %v928_v54 = vsel %vm575_vm8, %v925_v50, %v927_v53  ;;  %v929_v56 = vsel %vm575_vm8, %v927_v53, %v925_v50  ;;  %v968_v53 = vrot.slane %v2337_v15, 5 }
 0x488   : > { %v939_v58 = vpop.permute.xlu1 %938  ;;  %v936_v3 = vmul.f32 %v932_v51, %v929_v56  ;;  %v937_v4 = vmul.f32 %v933_v52, %v928_v54  ;;  %v969_v54 = vrot.slane %v2340_v17, 5  ;;  %v1034_v56 = vstv %s2613_s24  ;;  %s2673_s24 = sld [smem:[#allocation11 + %s1060_s1]] }
 0x48a   : > { %v941_v5 = vpop.permute.xlu0 %940  ;;  %v1014_v32 = vmul.f32 %v1013_v2, %v936_v3  ;;  %v1015_v33 = vmul.f32 %v1013_v2, %v937_v4 }
 0x48b   : > { %v942_v13 = vsel %vm584_vm5, %v939_v58, %v941_v5  ;;  %v943_v14 = vsel %vm584_vm5, %v941_v5, %v939_v58 }
 0x48c   : > { %v948_v16 = vmul.f32 %v944_v55, %v943_v14  ;;  %v949_v20 = vmul.f32 %v945_v0, %v942_v13  ;;  %v951_v22 = vpop.permute.xlu1 %950  ;;  %v1016_v57 = vadd.f32 %v1014_v32, %v1009_v36  ;;  %v1017_v59 = vadd.f32 %v1015_v33, %v1010_v38 }
 0x48d   : > { %v980_v13 = vrot.slane %v2337_v15, 6  ;;  %v981_v14 = vrot.slane %v2340_v17, 6 }
 0x48e   : > { %v953_v35 = vpop.permute.xlu0 %952  ;;  %v1021_v44 = vmul.f32 %v1020_v31, %v948_v16  ;;  %v1022_v45 = vmul.f32 %v1020_v31, %v949_v20  ;;  %v1035_v16 = vmul.f32 %v1034_v56, %v2549_v46 }
 0x48f   : > { %v954_v39 = vsel %vm593_vm6, %v951_v22, %v953_v35  ;;  %v955_v43 = vsel %vm593_vm6, %v953_v35, %v951_v22  ;;  %v1036_v35 = vmul.f32 %v1034_v56, %v2553_v47  ;;  %v993_v47 = vrot.slane %v2340_v17, 7 }
 0x490   : > { %v960_v48 = vmul.f32 %v956_v23, %v955_v43  ;;  %v961_v49 = vmul.f32 %v957_v25, %v954_v39  ;;  %v963_v50 = vpop.permute.xlu1 %962  ;;  %v1023_v5 = vadd.f32 %v1021_v44, %v1016_v57  ;;  %v1024_v6 = vadd.f32 %v1022_v45, %v1017_v59 }
 0x491   : > { %v992_v44 = vrot.slane %v2337_v15, 7  ;;  %v1048_v45 = vstv %s2651_s5  ;;  %v1055_v59 = vstv %s2657_s6  ;;  %s1164_s5 = sadd.s32 14, %s2586_s19  ;;  %s1171_s6 = sadd.s32 15, %s2586_s19 }
 0x492   : > { %v1028_v58 = vmul.f32 %v1027_v34, %v960_v48  ;;  %v1029_v1 = vmul.f32 %v1027_v34, %v961_v49  ;;  %v965_v2 = vpop.permute.xlu0 %964  ;;  %v1041_v34 = vstv %s2641_s4  ;;  %s2771_s1 = sld [smem:[#allocation11 + %s1164_s5]]  ;;  %s1991_s5 = smov (!%p1571_p3), 1  }
 0x493   : > { %v966_v3 = vsel %vm602_vm4, %v963_v50, %v965_v2  ;;  %v967_v4 = vsel %vm602_vm4, %v965_v2, %v963_v50  ;;  %s2779_s9 = sld [smem:[#allocation11 + %s1171_s6]]  ;;  %s1993_s6 = smov (!%p1571_p3), 17  }
 0x494   : > { %v975_v12 = vpop.permute.xlu1 %974  ;;  %v1030_v20 = vadd.f32 %v1028_v58, %v1023_v5  ;;  %v1031_v22 = vadd.f32 %v1029_v1, %v1024_v6  ;;  %v972_v31 = vmul.f32 %v968_v53, %v966_v3  ;;  %v973_v32 = vmul.f32 %v969_v54, %v967_v4 }
 0x496   : > { %v977_v33 = vpop.permute.xlu0 %976  ;;  %v1037_v48 = vadd.f32 %v1035_v16, %v1030_v20  ;;  %v1038_v49 = vadd.f32 %v1036_v35, %v1031_v22  ;;  %v1042_v50 = vmul.f32 %v1041_v34, %v972_v31  ;;  %v1043_v56 = vmul.f32 %v1041_v34, %v973_v32 }
 0x497   : > { %v978_v36 = vsel %vm611_vm1, %v975_v12, %v977_v33  ;;  %v979_v46 = vsel %vm611_vm1, %v977_v33, %v975_v12  ;;  %v1062_v32 = vstv %s2673_s24  ;;  %s1178_s24 = sadd.s32 16, %s2586_s19 }
 0x498   : > { %v984_v38 = vmul.f32 %v980_v13, %v978_v36  ;;  %v985_v39 = vmul.f32 %v981_v14, %v979_v46  ;;  %v987_v43 = vpop.permute.xlu1 %986  ;;  %v1044_v6 = vadd.f32 %v1042_v50, %v1037_v48  ;;  %v1045_v12 = vadd.f32 %v1043_v56, %v1038_v49 }
 0x499   : > { %v1069_v49 = vstv %s1068_s7  ;;  %s1185_s7 = sadd.s32 17, %s2586_s19 }
 0x49a   : > { %v989_v57 = vpop.permute.xlu0 %988  ;;  %v1049_v2 = vmul.f32 %v1048_v45, %v984_v38  ;;  %v1050_v3 = vmul.f32 %v1048_v45, %v985_v39 }
 0x49b   : > { %v990_v58 = vsel %vm620_vm2, %v987_v43, %v989_v57  ;;  %v991_v1 = vsel %vm620_vm2, %v989_v57, %v987_v43 }
 0x49c   : > { %v996_v4 = vmul.f32 %v992_v44, %v990_v58  ;;  %v997_v5 = vmul.f32 %v993_v47, %v991_v1  ;;  %v999_v22 = vpop.permute.xlu1 %998  ;;  %v1051_v35 = vadd.f32 %v1049_v2, %v1044_v6  ;;  %v1052_v36 = vadd.f32 %v1050_v3, %v1045_v12 }
 0x49e   : > { %v1056_v16 = vmul.f32 %v1055_v59, %v996_v4  ;;  %v1057_v20 = vmul.f32 %v1055_v59, %v997_v5  ;;  %v1001_v31 = vpop.permute.xlu0 %1000 }
 0x49f   : > { %v1002_v33 = vsel %vm629_vm0, %v999_v22, %v1001_v31  ;;  %v1003_v34 = vsel %vm629_vm0, %v1001_v31, %v999_v22 }
 0x4a0   : > { %v1004_v46 = vmul.f32 %v1002_v33, %v2332_v10  ;;  %v1005_v38 = vmul.f32 %v1003_v34, %v2334_v11  ;;  %v1058_v39 = vadd.f32 %v1056_v16, %v1051_v35  ;;  %v1059_v43 = vadd.f32 %v1057_v20, %v1052_v36 }
 0x4a2   : > { %v1063_v45 = vmul.f32 %v1062_v32, %v1004_v46  ;;  %v1064_v48 = vmul.f32 %v1062_v32, %v1005_v38 }
 0x4a4   : > { %v1065_v50 = vadd.f32 %v1063_v45, %v1058_v39  ;;  %v1066_v56 = vadd.f32 %v1064_v48, %v1059_v43 }
 0x4a6   : > { %v1070_v57 = vadd.f32 %v1069_v49, %v1065_v50  ;;  %v1071_v59 = vadd.f32 %v1069_v49, %v1066_v56 }
 0x4a8   : > { %v2699_v58 = vmax.f32 %v1070_v57, 0.0  ;;  %v2701_v1 = vmax.f32 %v1071_v59, 0.0 }
 0x4aa   : > { %1074 = vrot.lane.b32.xlu1 %v2699_v58, %s1982_s28  ;;  %1076 = vrot.lane.b32.xlu0 %v2701_v1, %s1982_s28 }
 0x4ae   : > { %1082 = vrot.lane.b32.xlu1 %v2699_v58, %s1983_s23  ;;  %1084 = vrot.lane.b32.xlu0 %v2701_v1, %s1983_s23  ;;  %s1150_s23 = sadd.s32 12, %s2586_s19 }
 0x4af   : > { %s2741_s25 = sld [smem:[#allocation11 + %s1150_s23]]  ;;  %s1199_s23 = sadd.s32 19, %s2586_s19 }
 0x4b2   : > { %1090 = vrot.lane.b32.xlu1 %v2699_v58, %s1979_s30  ;;  %1092 = vrot.lane.b32.xlu0 %v2701_v1, %s1979_s30  ;;  %s3016_s30 = smov 111  }
 0x4b5   : > { %v1152_v43 = vstv %s2741_s25  ;;  %s1988_s25 = smov (!%p1571_p3), 112  }
 0x4b6   : > { %1098 = vrot.lane.b32.xlu1 %v2699_v58, %s1980_s27  ;;  %1100 = vrot.lane.b32.xlu0 %v2701_v1, %s1980_s27  ;;  %s1143_s27 = sadd.s32 11, %s2586_s19 }
 0x4b7   : > { %s1144_s28 = sld [smem:[#allocation11 + %s1143_s27]] }
 0x4b8   : > { %s2792_s27 = sld [smem:[#allocation11 + %s1185_s7]] }
 0x4b9   : > { %s3017_s7 = sld [smem:[#allocation26_spill]] (!%p1571_p3) }
 0x4ba   : > { %1106 = vrot.lane.b32.xlu1 %v2699_v58, %s1978_s22  ;;  %1108 = vrot.lane.b32.xlu0 %v2701_v1, %s1978_s22  ;;  %s1138_s22 = sadd.s32 10, %s2586_s19 }
 0x4bb   : > { %s2739_s4 = sld [smem:[#allocation11 + %s1138_s22]]  ;;  %s1192_s22 = sadd.s32 18, %s2586_s19 }
 0x4bd   : > { %v1145_v22 = vstv %s1144_s28  ;;  %s2805_s28 = sld [smem:[#allocation11 + %s1192_s22]] }
 0x4be   : > { %1114 = vrot.lane.b32.xlu1 %v2699_v58, %s1975_s29  ;;  %1116 = vrot.lane.b32.xlu0 %v2701_v1, %s1975_s29  ;;  %s1157_s29 = sadd.s32 13, %s2586_s19  ;;  %s1986_s19 = smov (!%p1571_p3), 113  }
 0x4c1   : > { %v1140_v39 = vstv %s2739_s4  ;;  %s1987_s4 = smov (!%p1571_p3), 111  }
 0x4c2   : > { %1122 = vrot.lane.b32.xlu1 %v2699_v58, %s1977_s18  ;;  %1124 = vrot.lane.b32.xlu0 %v2701_v1, %s1977_s18  ;;  %s2743_s18 = sld [smem:[#allocation11 + %s1157_s29]] }
 0x4c3   : > { %s1200_s29 = sld [smem:[#allocation11 + %s1199_s23]] }
 0x4c6   : > { %1130 = vrot.lane.b32.xlu1 %v2699_v58, %s3016_s30  ;;  %1132 = vrot.lane.b32.xlu0 %v2701_v1, %s3016_s30  ;;  %s2786_s30 = sld [smem:[#allocation11 + %s1178_s24]] }
 0x4c8   : > { %v1159_v50 = vstv %s2743_s18  ;;  %s1989_s18 = smov (!%p1571_p3), 127  }
 0x51c   : > { %v1075_v2 = vpop.permute.xlu1 %1074  ;;  %v1077_v3 = vpop.permute.xlu0 %1076 }
 0x51d   : > { %v1078_v16 = vsel %vm566_vm7, %v1075_v2, %v1077_v3  ;;  %v1079_v20 = vsel %vm566_vm7, %v1077_v3, %v1075_v2 }
 0x51e   : > { %v1080_v35 = vmul.f32 %v1079_v20, %v2337_v15  ;;  %v1081_v36 = vmul.f32 %v1078_v16, %v2340_v17 }
 0x520   : > { %v1083_v4 = vpop.permute.xlu1 %1082  ;;  %v1085_v5 = vpop.permute.xlu0 %1084  ;;  %v1141_v57 = vmul.f32 %v1140_v39, %v1080_v35  ;;  %v1142_v59 = vmul.f32 %v1140_v39, %v1081_v36 }
 0x521   : > { %v1086_v6 = vsel %vm575_vm8, %v1083_v4, %v1085_v5  ;;  %v1087_v12 = vsel %vm575_vm8, %v1085_v5, %v1083_v4 }
 0x522   : > { %v1088_v31 = vmul.f32 %v1087_v12, %v932_v51  ;;  %v1089_v32 = vmul.f32 %v1086_v6, %v933_v52 }
 0x524   : > { %v1091_v33 = vpop.permute.xlu1 %1090  ;;  %v1093_v34 = vpop.permute.xlu0 %1092  ;;  %v1146_v45 = vmul.f32 %v1145_v22, %v1088_v31  ;;  %v1147_v48 = vmul.f32 %v1145_v22, %v1089_v32 }
 0x525   : > { %v1094_v46 = vsel %vm584_vm5, %v1091_v33, %v1093_v34  ;;  %v1095_v38 = vsel %vm584_vm5, %v1093_v34, %v1091_v33  ;;  %v1166_v34 = vstv %s2771_s1  ;;  %s1994_s1 = smov (!%p1571_p3), 16  }
 0x526   : > { %v1096_v51 = vmul.f32 %v1095_v38, %v944_v55  ;;  %v1097_v52 = vmul.f32 %v1094_v46, %v945_v0  ;;  %v1148_v6 = vadd.f32 %v1146_v45, %v1141_v57  ;;  %v1149_v12 = vadd.f32 %v1147_v48, %v1142_v59 }
 0x527   : > { %v1167_v48 = vmul.f32 %v1166_v34, %v2699_v58 }
 0x528   : > { %v1099_v49 = vpop.permute.xlu1 %1098  ;;  %v1101_v56 = vpop.permute.xlu0 %1100  ;;  %v1153_v0 = vmul.f32 %v1152_v43, %v1096_v51  ;;  %v1154_v3 = vmul.f32 %v1152_v43, %v1097_v52  ;;  %v1173_v52 = vstv %s2779_s9 }
 0x529   : > { %v1102_v2 = vsel %vm593_vm6, %v1099_v49, %v1101_v56  ;;  %v1103_v55 = vsel %vm593_vm6, %v1101_v56, %v1099_v49  ;;  %v1168_v49 = vmul.f32 %v1166_v34, %v2701_v1 }
 0x52a   : > { %v1104_v4 = vmul.f32 %v1103_v55, %v956_v23  ;;  %v1105_v5 = vmul.f32 %v1102_v2, %v957_v25  ;;  %v1155_v33 = vadd.f32 %v1153_v0, %v1148_v6  ;;  %v1156_v25 = vadd.f32 %v1154_v3, %v1149_v12 }
 0x52b   : > { %v1187_v3 = vstv %s2792_s27 }
 0x52c   : > { %v1160_v16 = vmul.f32 %v1159_v50, %v1104_v4  ;;  %v1161_v20 = vmul.f32 %v1159_v50, %v1105_v5  ;;  %v1107_v22 = vpop.permute.xlu1 %1106  ;;  %v1109_v31 = vpop.permute.xlu0 %1108  ;;  %v1180_v50 = vstv %s2786_s30 }
 0x52d   : > { %v1110_v32 = vsel %vm602_vm4, %v1107_v22, %v1109_v31  ;;  %v1111_v23 = vsel %vm602_vm4, %v1109_v31, %v1107_v22 }
 0x52e   : > { %v1162_v35 = vadd.f32 %v1160_v16, %v1155_v33  ;;  %v1163_v36 = vadd.f32 %v1161_v20, %v1156_v25  ;;  %v1112_v46 = vmul.f32 %v1110_v32, %v968_v53  ;;  %v1113_v38 = vmul.f32 %v1111_v23, %v969_v54 }
 0x52f   : > { %v1194_v32 = vstv %s2805_s28 }
 0x530   : > { %v1115_v39 = vpop.permute.xlu1 %1114  ;;  %v1117_v51 = vpop.permute.xlu0 %1116  ;;  %v1169_v56 = vadd.f32 %v1167_v48, %v1162_v35  ;;  %v1170_v57 = vadd.f32 %v1168_v49, %v1163_v36  ;;  %v1174_v59 = vmul.f32 %v1173_v52, %v1112_v46  ;;  %v1175_v2 = vmul.f32 %v1173_v52, %v1113_v38 }
 0x531   : > { %v1118_v43 = vsel %vm611_vm1, %v1115_v39, %v1117_v51  ;;  %v1119_v45 = vsel %vm611_vm1, %v1117_v51, %v1115_v39  ;;  %v1201_v46 = vstv %s1200_s29 }
 0x532   : > { %v1120_v53 = vmul.f32 %v1118_v43, %v980_v13  ;;  %v1121_v54 = vmul.f32 %v1119_v45, %v981_v14  ;;  %v1176_v6 = vadd.f32 %v1174_v59, %v1169_v56  ;;  %v1177_v12 = vadd.f32 %v1175_v2, %v1170_v57  ;;  %v1740_v2 = vld [vmem:[#allocation2] sm:$0xff] }
 0x534   : > { %v1123_v55 = vpop.permute.xlu1 %1122  ;;  %v1125_v0 = vpop.permute.xlu0 %1124  ;;  %v1181_v13 = vmul.f32 %v1180_v50, %v1120_v53  ;;  %v1182_v4 = vmul.f32 %v1180_v50, %v1121_v54 }
 0x535   : > { %v1126_v58 = vsel %vm620_vm2, %v1123_v55, %v1125_v0  ;;  %v1127_v1 = vsel %vm620_vm2, %v1125_v0, %v1123_v55  ;;  %v1741_v0 = vld [vmem:[#allocation2 + $0x8] sm:$0xff] }
 0x536   : > { %v1128_v14 = vmul.f32 %v1126_v58, %v992_v44  ;;  %v1129_v5 = vmul.f32 %v1127_v1, %v993_v47  ;;  %v1183_v25 = vadd.f32 %v1181_v13, %v1176_v6  ;;  %v1184_v34 = vadd.f32 %v1182_v4, %v1177_v12 }
 0x538   : > { %v1188_v16 = vmul.f32 %v1187_v3, %v1128_v14  ;;  %v1189_v20 = vmul.f32 %v1187_v3, %v1129_v5  ;;  %v1131_v22 = vpop.permute.xlu1 %1130  ;;  %v1133_v31 = vpop.permute.xlu0 %1132 }
 0x539   : > { %v1134_v23 = vsel %vm629_vm0, %v1131_v22, %v1133_v31  ;;  %v1135_v33 = vsel %vm629_vm0, %v1133_v31, %v1131_v22 }
 0x53a   : > { %v1136_v15 = vmul.f32 %v1134_v23, %v2332_v10  ;;  %v1137_v17 = vmul.f32 %v1135_v33, %v2334_v11  ;;  %v1190_v44 = vadd.f32 %v1188_v16, %v1183_v25  ;;  %v1191_v47 = vadd.f32 %v1189_v20, %v1184_v34 }
 0x53c   : > { %v1195_v35 = vmul.f32 %v1194_v32, %v1136_v15  ;;  %v1196_v36 = vmul.f32 %v1194_v32, %v1137_v17 }
 0x53e   : > { %v1197_v38 = vadd.f32 %v1195_v35, %v1190_v44  ;;  %v1198_v39 = vadd.f32 %v1196_v36, %v1191_v47 }
 0x540   : > { %v1202_v51 = vadd.f32 %v1201_v46, %v1197_v38  ;;  %v1203_v52 = vadd.f32 %v1201_v46, %v1198_v39 }
 0x542   : > { %v1569_v43 = vmul.f32 -1.442695, %v1202_v51  ;;  %v1570_v45 = vmul.f32 -1.442695, %v1203_v52 }
 0x544   : > { %1732 = vpow2.f32 %v1569_v43 }
 0x545   : > { %1734 = vpow2.f32 %v1570_v45 }
 0x551   : > { %v1733_v48 = vpop.eup %1732 }
 0x552   : > { %v1735_v49 = vpop.eup %1734  ;;  %v1210_v53 = vadd.f32 1.0, %v1733_v48 }
 0x553   : > { %v1211_v54 = vadd.f32 1.0, %v1735_v49 }
 0x554   : > { %1736 = vrcp.f32 %v1210_v53 }
 0x555   : > { %1738 = vrcp.f32 %v1211_v54 }
 0x561   : > { %v1737_v10 = vpop.eup %1736 }
 0x562   : > { %v1739_v11 = vpop.eup %1738  ;;  %v1219_v50 = vrot.slane %v1737_v10, %v2330_v9 }
 0x563   : > { %v1223_v56 = vrot.slane %v1739_v11, %v2330_v9 }
 0x564   : > { %v1224_v57 = vmul.f32 %v1219_v50, %v2545_v42 }
 0x565   : > { %v1225_v59 = vmul.f32 %v1223_v56, %v2543_v40  ;;  %1233 = sbr.rel (%p1571_p3) target bundleno = 1743 (0x6cf), region = 80 }
 0x566   : > { %v1226_v55 = vadd.f32 %v1740_v2, %v1224_v57 }
 0x567   : > { %v1227_v3 = vadd.f32 %v1741_v0, %v1225_v59 }
 0x568   : > { %1228 = vst [vmem:[#allocation2] sm:$0xff] %v1226_v55 }
 0x569   : > { %1229 = vst [vmem:[#allocation2 + $0x8] sm:$0xff] %v1227_v3 }
 0x56a   : > { %v1992_v40 = vmov 0   ;;  %v1312_v8 = vld [vmem:[%s2271_s21] sm:$0xff] }
 0x56b   : > { %1355 = vmatprep.mubr.bf16.mxu0 %v1992_v40 }
 0x56f   : > { %v2836_v58 = vld [vmem:[#allocation2] sm:$0xff] }
 0x570   : > { %1277 = vrot.lane.b32.xlu1 %v2836_v58, %s1986_s19  ;;  %1293 = vrot.lane.b32.xlu0 %v2836_v58, %s1987_s4  ;;  %v1235_v9 = vld [vmem:[#allocation2 + $0x8] sm:$0xff] }
 0x574   : > { %1279 = vrot.lane.b32.xlu1 %v1235_v9, %s1986_s19  ;;  %1295 = vrot.lane.b32.xlu0 %v1235_v9, %s1987_s4 }
 0x578   : > { %1287 = vrot.lane.b32.xlu1 %v1235_v9, %s1988_s25  ;;  %1285 = vrot.lane.b32.xlu0 %v2836_v58, %s1988_s25 }
 0x57c   : > { %1271 = vrot.lane.b32.xlu1 %v1235_v9, %s1989_s18  ;;  %1269 = vrot.lane.b32.xlu0 %v2836_v58, %s1989_s18 }
 0x580   : > { %1255 = vrot.lane.b32.xlu1 %v1235_v9, %s1990_s17  ;;  %1253 = vrot.lane.b32.xlu0 %v2836_v58, %s1990_s17 }
 0x584   : > { %1263 = vrot.lane.b32.xlu1 %v1235_v9, %s1991_s5  ;;  %1261 = vrot.lane.b32.xlu0 %v2836_v58, %s1991_s5 }
 0x588   : > { %1239 = vrot.lane.b32.xlu1 %v1235_v9, %s1993_s6  ;;  %1237 = vrot.lane.b32.xlu0 %v2836_v58, %s1993_s6 }
 0x58c   : > { %1247 = vrot.lane.b32.xlu1 %v1235_v9, %s1994_s1  ;;  %1245 = vrot.lane.b32.xlu0 %v2836_v58, %s1994_s1 }
 0x5e2   : > { %v1278_v42 = vpop.permute.xlu1 %1277  ;;  %v1294_v1 = vpop.permute.xlu0 %1293 }
 0x5e6   : > { %v1280_v13 = vpop.permute.xlu1 %1279  ;;  %v1296_v4 = vpop.permute.xlu0 %1295 }
 0x5e7   : > { %v1298_v14 = vsel %vm629_vm0, %v1296_v4, %v1294_v1  ;;  %v1297_v5 = vsel %vm629_vm0, %v1294_v1, %v1296_v4  ;;  %v1281_v6 = vsel %vm611_vm1, %v1278_v42, %v1280_v13  ;;  %v1282_v20 = vsel %vm611_vm1, %v1280_v13, %v1278_v42  ;;  %v1313_v13 = vld [vmem:[%s2271_s21 + $0x8] sm:$0xff] }
 0x5e8   : > { %v1300_v12 = vmul.f32 %v1298_v14, %v2349_v19  ;;  %v1299_v16 = vmul.f32 %v1297_v5, %v2344_v18  ;;  %v1283_v33 = vmul.f32 %v1281_v6, %v2353_v21  ;;  %v1284_v15 = vmul.f32 %v1282_v20, %v2358_v24 }
 0x5ea   : > { %v1288_v22 = vpop.permute.xlu1 %1287  ;;  %v1286_v31 = vpop.permute.xlu0 %1285  ;;  %v1310_v32 = vpack.c.bf16 %v1300_v12, %v1300_v12  ;;  %v1309_v23 = vpack.c.bf16 %v1299_v16, %v1299_v16 }
 0x5eb   : > { %v1289_v25 = vsel %vm620_vm2, %v1286_v31, %v1288_v22  ;;  %v1290_v34 = vsel %vm620_vm2, %v1288_v22, %v1286_v31 }
 0x5ec   : > { %v1291_v19 = vmul.f32 %v1289_v25, %v2365_v27  ;;  %v1292_v18 = vmul.f32 %v1290_v34, %v2371_v30  ;;  %1572 = vmatprep.subr.msk.bf16.mxu0 %vm654_vm3, %v1310_v32  ;;  %v1318_v17 = vsel %vm654_vm3, %v1309_v23, 0 }
 0x5ed   : > { %1330 = vmatpush1.bf16.msra.mxu0 %v1318_v17 }
 0x5ee   : > { %v1272_v44 = vpop.permute.xlu1 %1271  ;;  %v1270_v47 = vpop.permute.xlu0 %1269  ;;  %v1308_v21 = vpack.c.bf16 %v1292_v18, %v1284_v15  ;;  %v1307_v35 = vpack.c.bf16 %v1291_v19, %v1283_v33 }
 0x5ef   : > { %v1273_v36 = vsel %vm602_vm4, %v1270_v47, %v1272_v44  ;;  %v1274_v46 = vsel %vm602_vm4, %v1272_v44, %v1270_v47 }
 0x5f0   : > { %v1275_v24 = vmul.f32 %v1273_v36, %v2377_v37  ;;  %v1276_v27 = vmul.f32 %v1274_v46, %v2386_v41  ;;  %1331 = vmatprep.subr.bf16.mxu0 %v1308_v21 }
 0x5f1   : > { %1332 = vmatpush1.bf16.msra.mxu0 %v1307_v35 }
 0x5f2   : > { %v1256_v30 = vpop.permute.xlu1 %1255  ;;  %v1254_v38 = vpop.permute.xlu0 %1253  ;;  %v1306_v39 = vpack.c.bf16 %v1276_v27, %v1235_v9  ;;  %v1305_v51 = vpack.c.bf16 %v1275_v24, %v2836_v58  ;;  %v1236_v9 = vld [vmem:[%s3017_s7] sm:$0xff] }
 0x5f3   : > { %v1257_v52 = vsel %vm584_vm5, %v1254_v38, %v1256_v30  ;;  %v1258_v43 = vsel %vm584_vm5, %v1256_v30, %v1254_v38  ;;  %v1311_v1 = vpack.c.bf16 %v1236_v9, %v1236_v9 }
 0x5f4   : > { %1333 = vmatprep.subr.bf16.mxu0 %v1306_v39  ;;  %v1259_v49 = vmul.f32 %v1258_v43, %v2406_v60  ;;  %v1260_v53 = vmul.f32 %v1257_v52, %v2409_v61 }
 0x5f5   : > { %1334 = vmatpush1.bf16.msra.mxu0 %v1305_v51 }
 0x5f6   : > { %v1264_v45 = vpop.permute.xlu1 %1263  ;;  %v1262_v48 = vpop.permute.xlu0 %1261 }
 0x5f7   : > { %v1265_v37 = vsel %vm593_vm6, %v1262_v48, %v1264_v45  ;;  %v1266_v41 = vsel %vm593_vm6, %v1264_v45, %v1262_v48 }
 0x5f8   : > { %v1267_v54 = vmul.f32 %v1266_v41, %v2412_v62  ;;  %v1268_v10 = vmul.f32 %v1265_v37, %v2415_v63 }
 0x5fa   : > { %v1240_v11 = vpop.permute.xlu1 %1239  ;;  %v1238_v50 = vpop.permute.xlu0 %1237  ;;  %v1304_v56 = vpack.c.bf16 %v1268_v10, %v1260_v53  ;;  %v1303_v57 = vpack.c.bf16 %v1267_v54, %v1259_v49 }
 0x5fb   : > { %v1241_v59 = vsel %vm566_vm7, %v1238_v50, %v1240_v11  ;;  %v1242_v2 = vsel %vm566_vm7, %v1240_v11, %v1238_v50 }
 0x5fc   : > { %1335 = vmatprep.subr.bf16.mxu0 %v1304_v56  ;;  %v1243_v63 = vmul.f32 %v1242_v2, %v2433_v26  ;;  %v1244_v0 = vmul.f32 %v1241_v59, %v2437_v7 }
 0x5fd   : > { %1336 = vmatpush1.bf16.msra.mxu0 %v1303_v57 }
 0x5fe   : > { %v1248_v60 = vpop.permute.xlu1 %1247  ;;  %v1246_v55 = vpop.permute.xlu0 %1245 }
 0x5ff   : > { %v1249_v61 = vsel %vm575_vm8, %v1246_v55, %v1248_v60  ;;  %v1250_v62 = vsel %vm575_vm8, %v1248_v60, %v1246_v55 }
 0x600   : > { %v1251_v3 = vmul.f32 %v1250_v62, %v2440_v28  ;;  %v1252_v58 = vmul.f32 %v1249_v61, %v2443_v29 }
 0x602   : > { %v1301_v40 = vpack.c.bf16 %v1251_v3, %v1243_v63  ;;  %v1302_v42 = vpack.c.bf16 %v1252_v58, %v1244_v0 }
 0x604   : > { %1337 = vmatprep.subr.bf16.mxu0 %v1302_v42 }
 0x605   : > { %1338 = vmatpush1.bf16.msra.mxu0 %v1301_v40 }
 0x608   : > { %1573 = vmatmul.mubr.msk.bf16.vlgmr.msra.gmra.mxu0 %vm650_vm9, %v1311_v1 }
 0x6c8   : > { %v1357_v26 = vpop.f32.mrf.mxu0 }
 0x6c9   : > { %v1358_v7 = vadd.f32 %v1357_v26, %v1312_v8 }
 0x6ca   : > { %v1359_v4 = vpop.f32.mrf.mxu0 }
 0x6cb   : > { %1364 = vst [vmem:[%s2283_s26] sm:$0xff] %v1358_v7  ;;  %v1360_v28 = vadd.f32 %v1359_v4, %v1313_v13 }
 0x6cc   : > { %v1361_v29 = vpop.f32.mrf.mxu0 }
 0x6cd   : > { %1365 = vst [vmem:[%s2283_s26 + $0x8] sm:$0xff] %v1360_v28 }
 0x6ce   : > { %v1362_v14 = vpop.f32.mrf.mxu0 }
 0x6cf PF: > { %s1580_s30 = sshll.u32 %s1955_s8, 8  ;;  %s3018_s28 = sld [smem:[#allocation28_spill]] }
 0x6d0   : > { %s1381_s29 = sshll.u32 %s2283_s26, 4  ;;  %s3019_s21 = sand.u32 1, %s1931_s12   ;;  %s1382_s29 = int_to_ptr.vmem [resolvable:$true] %s1381_s29 }
 0x6d1   : > { %s1367_s19 = scalar_lea.sflag [#allocation6], %s3019_s21  ;;  %s1839_s4 = scalar_lea.vmem %s1382_s29, 256 }
 0x6d2   : > { %p1840_p2 = scmp.ne.s32.totalorder %s1382_s29, %s1839_s4  ;;  %p3020_p5 = scmp.ne.s32.totalorder %s3001_s10, 0 }
 0x6d3   : > { %s1995_s25 = smov [#allocation12]  }
 0x6d4   : > { %p1841_p0 = pnand %p1840_p2, %p3020_p5  ;;  %s1843_s18 = sshll.u32 %s1995_s25, 4  ;;  %s1844_s18 = int_to_ptr.vmem [resolvable:$false] %s1843_s18 }
 0x6d5   : > { %s1379_s23 = scalar_lea.hbm %s3018_s28, %s1580_s30  ;;  %s1845_s17 = scalar_lea.vmem %s1844_s18, 512 }
 0x6d6   : > { %p1842_p10 = pneg %p1841_p0  ;;  %p1846_p11 = scmp.lt.s32.totalorder %s1382_s29, %s1844_s18 }
 0x6d7   : > { %p1847_p6 = scmp.lt.s32.totalorder %s1845_s17, %s1839_s4 }
 0x6d9   : > { %p1848_p12 = por %p1847_p6, %p1846_p11 }
 0x6db   : > { %p1849_p8 = pnand %p1848_p12, %p1842_p10 }
 0x6dd   : > { %1852 = shalt.err (!%p1849_p8)
}
 0x6de   : > { %s1853_s8 = scalar_lea.hbm %s1379_s23, 256  ;;  %s1857_s6 = scalar_lea.hbm %s3018_s28, 512 }
 0x6df   : > { %p1854_p7 = scmp.ne.s32.totalorder %s1379_s23, %s1853_s8  ;;  %p1858_p9 = scmp.lt.s32.totalorder %s1379_s23, %s3018_s28 }
 0x6e0   : > { %p1859_p13 = scmp.lt.s32.totalorder %s1857_s6, %s1853_s8 }
 0x6e1   : > { %p1855_p1 = pnand %p1854_p7, %p3020_p5 }
 0x6e2   : > { %p1860_p3 = por %p1859_p13, %p1858_p9 }
 0x6e3   : > { %p1856_p4 = pneg %p1855_p1 }
 0x6e5   : > { %p1861_p2 = pnand %p1860_p3, %p1856_p4 }
 0x6e7   : > { %1864 = shalt.err (!%p1861_p2)
}
 0x6e8   : > { %1593 = dma.vmem_to_hbm [thread:$0]  (%p3020_p5), %s1382_s29, 256, %s1379_s23, %s1367_s19  }
 0x6e9 PF: > { %p1618_p0 = scmp.ge.s32.totalorder %s1967_s20, 2  ;;  %s1393_s9 = sand.u32 1, %s1927_s11  }
 0x6ea   : > { %p3021_p10 = scmp.ne.s32.totalorder %s3002_s14, 0  ;;  %s1394_s7 = scalar_lea.sflag [#allocation6], %s1393_s9 }
 0x6ec   : > { %p1610_p11 = pnand %p1618_p0, %p3021_p10 }
 0x6ee   : > { %p1611_p6 = pneg %p1610_p11 }
 0x6f0   : > { %1922 = dma.done.wait (%p1611_p6), %s1394_s7, 256  }
 0x6f1   : > { %1924 = vsyncadd (%p1611_p6), %s1394_s7, 4294967040  ;;  %s28_s20 = sadd.s32 1, %s1967_s20   ;;  %s3022_s10 = sld [smem:[#allocation21_spill]] }
 0x6f2   : > { %p25_p12 = scmp.ge.s32.totalorder %s28_s20, 6   ;;  %s3023_s17 = sld [smem:[#allocation17_spill]] }
 0x6f3   : > { %s3024_s8 = sld [smem:[#allocation18_spill]]  ;;  %s3027_s11 = smov %s1931_s12 }
 0x6f4   : > { %s3025_s18 = sld [smem:[#allocation19_spill]]  ;;  %s3028_s12 = smov %s1935_s13 }
 0x6f5   : > { %s3026_s19 = sld [smem:[#allocation20_spill]]  ;;  %s3029_s13 = smov %s2172_s2 }
 0x6f6   : > { %s3030_s14 = smov %s1943_s15  ;;  %s3031_s15 = smov %s1947_s16 }
 0x6f7   : > { %s3032_s16 = smov %s3022_s10  ;;  %27 = sbr.rel (!%p25_p12) target bundleno = 20 (0x14), region = 139 }
 0x6fc   :  { %1399 = vsyncpa [#allocation5], 1 }
 0x6fd   :  { %1401 = vsyncpa [#allocation5 + $0x1], 1 }
 0x6fe   :  { %1402 = vsyncpa [#allocation9], 1 }
 0x6ff   :  { %1404 = vsyncpa [#allocation9 + $0x1], 1 }
 0x700   :  { %1405 = vsyncpa [#allocation6], 1 }
 0x701   :  { %1407 = vsyncpa [#allocation6 + $0x1], 1 }
 0x702   :  { %1408 = vsyncpa [#allocation7], 1 }
 0x703   :  { %1410 = vsyncpa [#allocation7 + $0x1], 1 }

</bundles_post_ra>
